<compile_context>
chip_gen: v5e
topology: v5e:2x2
jax: 0.10.0
libtpu: 0.0.40
codegen_flags: <defaults>
</compile_context>

<pallas_src>
import functools

import jax
import jax.numpy as jnp
from jax.experimental import pallas as pl
from jax.experimental.pallas import tpu as pltpu


def weldon_kernel(x_ref, w_ref, b_ref, o_ref, *, n_top, n_bottom):
    # x_ref : (bt, N, F)  input dtype (f32 or bf16)
    # w_ref : (F, O)      same dtype as x
    # b_ref : (1, O)      f32
    # o_ref : (bt, O)     f32
    bt, N, F = x_ref.shape
    O = w_ref.shape[1]

    # ---- Scores on the MXU (idle otherwise); f32 accumulation. -----------
    # The (bt, N, F) -> (bt*N, F) collapse is layout-free when N % 8 == 0.
    x2d = x_ref[...].reshape(bt * N, F)
    s2d = jnp.dot(x2d, w_ref[...], preferred_element_type=jnp.float32)
    s2d = s2d + b_ref[...]                                   # (bt*N, O) f32

    # ---- Small relayout so the selection loop is lane-dense over N. ------
    if O == 1:
        s = s2d.reshape(bt, N)                               # (bt, N)
    else:
        s = jnp.swapaxes(s2d.reshape(bt, N, O), 1, 2).reshape(bt * O, N)
    R = bt * O                                               # selection rows

    col_ids = jax.lax.broadcasted_iota(jnp.int32, (R, N), 1)
    NEG = jnp.float32(-jnp.inf)
    POS = jnp.float32(jnp.inf)
    inv_k = jnp.float32(1.0 / (n_top + n_bottom))
    k_common = min(n_top, n_bottom)

    def take_max(s_, acc):
        vmax = jnp.max(s_, axis=-1, keepdims=True)           # XLU lane reduce
        imax = jnp.min(jnp.where(s_ == vmax, col_ids, N), axis=-1, keepdims=True)
        return jnp.where(col_ids == imax, NEG, s_), acc + vmax  # mask exactly one

    def take_min(s_, acc):
        vmin = jnp.min(s_, axis=-1, keepdims=True)
        imin = jnp.min(jnp.where(s_ == vmin, col_ids, N), axis=-1, keepdims=True)
        return jnp.where(col_ids == imin, POS, s_), acc + vmin

    # One fused selection loop for all (bag, output) rows at once.
    def fused(_, carry):
        st, sb, at_, ab_ = carry
        st, at_ = take_max(st, at_)
        sb, ab_ = take_min(sb, ab_)
        return st, sb, at_, ab_

    zero = jnp.zeros((R, 1), jnp.float32)
    st, sb, acc_t, acc_b = jax.lax.fori_loop(
        0, k_common, fused, (s, s, zero, zero), unroll=True)
    if n_top > k_common:
        st, acc_t = jax.lax.fori_loop(
            0, n_top - k_common, lambda _, c: take_max(*c), (st, acc_t), unroll=True)
    if n_bottom > k_common:
        sb, acc_b = jax.lax.fori_loop(
            0, n_bottom - k_common, lambda _, c: take_min(*c), (sb, acc_b), unroll=True)

    mean = (acc_t + acc_b) * inv_k                           # (R, 1)
    out = jax.nn.sigmoid(mean)
    o_ref[...] = out if O == 1 else out.reshape(bt, O)


def _tpu_hw_params():
    """(vmem_capacity_bytes, tensorcores_per_device) with safe fallbacks."""
    vmem_cap = 64 << 20          # conservative default (v7x per-TC VMEM)
    cores = 1
    try:
        vmem_cap = int(pltpu.get_tpu_info().vmem_capacity_bytes)
    except Exception:
        pass
    try:
        dev = jax.devices()[0]
        for name in ("num_cores", "core_count"):
            val = getattr(dev, name, None)
            if isinstance(val, int) and val > 0:
                cores = max(1, min(int(val), 8))
                break
    except Exception:
        pass
    return vmem_cap, cores


def _choose_bt(B, N, F, itemsize, vmem_cap, cores):
    """Bags per grid step: target an x block of ~<=12 MiB (<= VMEM/4)."""
    row_bytes = N * F * itemsize
    budget = max(min(12 << 20, vmem_cap // 4), row_bytes)
    bt = max(1, budget // row_bytes)
    if cores > 1 and B >= cores:
        # Multi-TensorCore device: keep the step count a multiple of the core
        # count so the "parallel" batch axis shards evenly.
        steps = pl.cdiv(max(pl.cdiv(B, bt), cores), cores) * cores
        bt = min(bt, pl.cdiv(B, steps))
    bt = min(bt, B)
    if bt < B and bt % 8 != 0:
        # Output block (bt, O): second-to-last dim must be a multiple of 8
        # unless it spans the whole batch.
        bt = (bt // 8) * 8 if bt >= 8 else min(8, B)
    return max(1, min(bt, B))


def weldon_forward(x, w, b, *, n_top, n_bottom):
    """x: (B, N, F) f32/bf16, w: (F, O), b: (O,)/(1, O) -> (B*O,) f32."""
    x = jnp.asarray(x)
    B, N, F = x.shape
    O = w.shape[1]
    assert 1 <= n_top <= N and 1 <= n_bottom <= N, "k must be in [1, N]"

    # Keep bf16/f32 inputs as-is (halves HBM traffic for bf16); anything else
    # goes to f32.  Weights are cast to x's dtype for the MXU matmul; bias and
    # all post-matmul math stay f32 (v5e-safe).
    if x.dtype.name not in ("bfloat16", "float32"):
        x = x.astype(jnp.float32)
    w = jnp.asarray(w).astype(x.dtype)
    b = jnp.asarray(b, jnp.float32).reshape(1, O)

    vmem_cap, cores = _tpu_hw_params()
    itemsize = x.dtype.itemsize
    bt = _choose_bt(B, N, F, itemsize, vmem_cap, cores)
    steps = pl.cdiv(B, bt)

    x_block_bytes = bt * N * F * itemsize
    slab_bytes = bt * O * N * 4
    # 2x block for double buffering + 1x in case the in-kernel reshape copies,
    # plus score-slab temporaries and slack.
    vmem_need = 3 * x_block_bytes + 8 * slab_bytes + (4 << 20)
    vmem_limit = int(min(vmem_cap, max(vmem_need, 32 << 20)))

    out = pl.pallas_call(
        functools.partial(weldon_kernel, n_top=n_top, n_bottom=n_bottom),
        out_shape=jax.ShapeDtypeStruct((B, O), jnp.float32),
        grid_spec=pltpu.PrefetchScalarGridSpec(
            num_scalar_prefetch=0,
            grid=(steps,),
            in_specs=[
                pl.BlockSpec((bt, N, F), lambda i: (i, 0, 0)),  # x tile
                pl.BlockSpec((F, O), lambda i: (0, 0)),         # weight (resident)
                pl.BlockSpec((1, O), lambda i: (0, 0)),         # bias   (resident)
            ],
            out_specs=pl.BlockSpec((bt, O), lambda i: (i, 0)),
        ),
        compiler_params=pltpu.CompilerParams(
            dimension_semantics=("parallel",),
            vmem_limit_bytes=vmem_limit),
    )(x, w, b)
    return out.reshape(-1)


def weldon_reference(x, w, b, *, n_top, n_bottom):
    scores = jnp.einsum("bnf,fo->bno", jnp.asarray(x, jnp.float32),
                        jnp.asarray(w, jnp.float32)) + jnp.reshape(b, (1, 1, -1))
    s_sorted = jnp.sort(scores, axis=1)
    top = s_sorted[:, -n_top:, :]
    bottom = s_sorted[:, :n_bottom, :]
    extreme = jnp.concatenate([top, bottom], axis=1)
    return jax.nn.sigmoid(jnp.mean(extreme, axis=1)).reshape(-1)


if __name__ == "__main__":
    key = jax.random.PRNGKey(0)
    k1, k2, k3, k4 = jax.random.split(key, 4)

    # Test 1: module defaults (out_features=1, n_top=n_bottom=10),
    # B=2 bags, N=32 instances, in_features=128.
    B, N, F, O = 2, 32, 128, 1
    n_top, n_bottom = 10, 10
    x = jax.random.normal(k1, (B, N, F), dtype=jnp.float32)
    bound = (6.0 / (F + O)) ** 0.5                  # Xavier-uniform init
    w = jax.random.uniform(k2, (F, O), jnp.float32, -bound, bound)
    b = jnp.zeros((1, O), jnp.float32)              # bias.data.fill_(0.0)

    out = jax.block_until_ready(
        weldon_forward(x, w, b, n_top=n_top, n_bottom=n_bottom))
    ref = weldon_reference(x, w, b, n_top=n_top, n_bottom=n_bottom)
    assert out.shape == (B * O,)
    assert jnp.allclose(out, ref, atol=1e-5, rtol=1e-5), (out, ref)

    # Test 2: general O > 1, n_top != n_bottom, odd batch.
    B2, N2, F2, O2 = 3, 16, 64, 3
    x2 = jax.random.normal(k3, (B2, N2, F2), dtype=jnp.float32)
    w2 = jax.random.normal(k4, (F2, O2), dtype=jnp.float32) * 0.1
    b2 = jnp.arange(O2, dtype=jnp.float32).reshape(1, O2) * 0.05
    out2 = jax.block_until_ready(
        weldon_forward(x2, w2, b2, n_top=3, n_bottom=2))
    ref2 = weldon_reference(x2, w2, b2, n_top=3, n_bottom=2)
    assert out2.shape == (B2 * O2,)
    assert jnp.allclose(out2, ref2, atol=1e-5, rtol=1e-5), (out2, ref2)

    # Test 3: bf16 activations (kept in bf16 through the HBM->MXU path).
    x3 = x.astype(jnp.bfloat16)
    out3 = jax.block_until_ready(
        weldon_forward(x3, w, b, n_top=n_top, n_bottom=n_bottom))
    assert out3.shape == (B * O,)
    assert jnp.all(jnp.isfinite(out3))
    assert jnp.allclose(out3, ref, atol=5e-2), (out3, ref)

    print("KERNEL_OK")
</pallas_src>

<mosaic_0001>
module attributes {stable_mosaic.version = 11 : i64} {
  func.func @weldon_kernel(%arg0: i32, %arg1: memref<2x32x128xf32, #tpu.memory_space<vmem>>, %arg2: memref<128x1xf32, #tpu.memory_space<vmem>>, %arg3: memref<1x1xf32, #tpu.memory_space<vmem>>, %arg4: memref<2x1xf32, #tpu.memory_space<vmem>>) attributes {dimension_semantics = [#tpu.dimension_semantics<parallel>], iteration_bounds = array<i64: 1>, scalar_prefetch = 0 : i64, scratch_operands = 0 : i64, tpu.core_type = #tpu.core_type<tc>, window_params = [{transform_indices = @transform_0, window_bounds = array<i64: 2, 32, 128>}, {pipeline_mode = #tpu.pipeline_mode<synchronous>, transform_indices = @transform_1, window_bounds = array<i64: 128, 1>}, {pipeline_mode = #tpu.pipeline_mode<synchronous>, transform_indices = @transform_2, window_bounds = array<i64: 1, 1>}, {transform_indices = @transform_3, window_bounds = array<i64: 2, 1>}]} {
    %c0 = arith.constant 0 : index
    %c0_0 = arith.constant 0 : index
    %c0_1 = arith.constant 0 : index
    %0 = vector.load %arg1[%c0, %c0_0, %c0_1] : memref<2x32x128xf32, #tpu.memory_space<vmem>>, vector<2x32x128xf32>
    %1 = vector.shape_cast %0 : vector<2x32x128xf32> to vector<64x128xf32>
    %c0_2 = arith.constant 0 : index
    %c0_3 = arith.constant 0 : index
    %2 = vector.load %arg2[%c0_2, %c0_3] : memref<128x1xf32, #tpu.memory_space<vmem>>, vector<128x1xf32>
    %cst = arith.constant dense<0.000000e+00> : vector<64x1xf32>
    %3 = tpu.matmul %1, %2, %cst {dimension_numbers = #tpu.dot_dimension_numbers<[1], [0], [0], [1], [0, 0, 1, 1], [], []>} : vector<64x128xf32>, vector<128x1xf32>, vector<64x1xf32> -> vector<64x1xf32>
    %c0_4 = arith.constant 0 : index
    %c0_5 = arith.constant 0 : index
    %4 = vector.load %arg3[%c0_4, %c0_5] : memref<1x1xf32, #tpu.memory_space<vmem>>, vector<1x1xf32>
    %5 = vector.broadcast %4 : vector<1x1xf32> to vector<64x1xf32>
    %6 = arith.addf %3, %5 : vector<64x1xf32>
    %7 = vector.shape_cast %6 : vector<64x1xf32> to vector<2x32xf32>
    %8 = tpu.iota {dimensions = array<i32: 1>} : vector<2x32xi32>
    %cst_6 = arith.constant 0.000000e+00 : f32
    %9 = vector.broadcast %cst_6 : f32 to vector<2x1xf32>
    %cst_7 = arith.constant 0xFF800000 : f32
    %cst_8 = arith.constant 0x7F800000 : f32
    %c0_i32 = arith.constant 0 : i32
    %cst_9 = arith.constant dense<0xFF800000> : vector<2xf32>
    %10 = vector.multi_reduction <maximumf>, %7, %cst_9 [1] : vector<2x32xf32> to vector<2xf32>
    %11 = vector.shape_cast %10 : vector<2xf32> to vector<2x1xf32>
    %12 = vector.broadcast %11 : vector<2x1xf32> to vector<2x32xf32>
    %13 = arith.cmpf oeq, %7, %12 : vector<2x32xf32>
    %c32_i32 = arith.constant 32 : i32
    %14 = vector.broadcast %c32_i32 : i32 to vector<2x32xi32>
    %15 = arith.select %13, %8, %14 : vector<2x32xi1>, vector<2x32xi32>
    %cst_10 = arith.constant dense<2147483647> : vector<2xi32>
    %16 = vector.multi_reduction <minsi>, %15, %cst_10 [1] : vector<2x32xi32> to vector<2xi32>
    %17 = vector.shape_cast %16 : vector<2xi32> to vector<2x1xi32>
    %18 = vector.broadcast %17 : vector<2x1xi32> to vector<2x32xi32>
    %19 = arith.cmpi eq, %8, %18 : vector<2x32xi32>
    %20 = vector.broadcast %cst_7 : f32 to vector<2x32xf32>
    %21 = arith.select %19, %20, %7 : vector<2x32xi1>, vector<2x32xf32>
    %22 = arith.addf %9, %11 : vector<2x1xf32>
    %cst_11 = arith.constant dense<0x7F800000> : vector<2xf32>
    %23 = vector.multi_reduction <minimumf>, %7, %cst_11 [1] : vector<2x32xf32> to vector<2xf32>
    %24 = vector.shape_cast %23 : vector<2xf32> to vector<2x1xf32>
    %25 = vector.broadcast %24 : vector<2x1xf32> to vector<2x32xf32>
    %26 = arith.cmpf oeq, %7, %25 : vector<2x32xf32>
    %c32_i32_12 = arith.constant 32 : i32
    %27 = vector.broadcast %c32_i32_12 : i32 to vector<2x32xi32>
    %28 = arith.select %26, %8, %27 : vector<2x32xi1>, vector<2x32xi32>
    %cst_13 = arith.constant dense<2147483647> : vector<2xi32>
    %29 = vector.multi_reduction <minsi>, %28, %cst_13 [1] : vector<2x32xi32> to vector<2xi32>
    %30 = vector.shape_cast %29 : vector<2xi32> to vector<2x1xi32>
    %31 = vector.broadcast %30 : vector<2x1xi32> to vector<2x32xi32>
    %32 = arith.cmpi eq, %8, %31 : vector<2x32xi32>
    %33 = vector.broadcast %cst_8 : f32 to vector<2x32xf32>
    %34 = arith.select %32, %33, %7 : vector<2x32xi1>, vector<2x32xf32>
    %35 = arith.addf %9, %24 : vector<2x1xf32>
    %c1_i32 = arith.constant 1 : i32
    %cst_14 = arith.constant dense<0xFF800000> : vector<2xf32>
    %36 = vector.multi_reduction <maximumf>, %21, %cst_14 [1] : vector<2x32xf32> to vector<2xf32>
    %37 = vector.shape_cast %36 : vector<2xf32> to vector<2x1xf32>
    %38 = vector.broadcast %37 : vector<2x1xf32> to vector<2x32xf32>
    %39 = arith.cmpf oeq, %21, %38 : vector<2x32xf32>
    %c32_i32_15 = arith.constant 32 : i32
    %40 = vector.broadcast %c32_i32_15 : i32 to vector<2x32xi32>
    %41 = arith.select %39, %8, %40 : vector<2x32xi1>, vector<2x32xi32>
    %cst_16 = arith.constant dense<2147483647> : vector<2xi32>
    %42 = vector.multi_reduction <minsi>, %41, %cst_16 [1] : vector<2x32xi32> to vector<2xi32>
    %43 = vector.shape_cast %42 : vector<2xi32> to vector<2x1xi32>
    %44 = vector.broadcast %43 : vector<2x1xi32> to vector<2x32xi32>
    %45 = arith.cmpi eq, %8, %44 : vector<2x32xi32>
    %46 = vector.broadcast %cst_7 : f32 to vector<2x32xf32>
    %47 = arith.select %45, %46, %21 : vector<2x32xi1>, vector<2x32xf32>
    %48 = arith.addf %22, %37 : vector<2x1xf32>
    %cst_17 = arith.constant dense<0x7F800000> : vector<2xf32>
    %49 = vector.multi_reduction <minimumf>, %34, %cst_17 [1] : vector<2x32xf32> to vector<2xf32>
    %50 = vector.shape_cast %49 : vector<2xf32> to vector<2x1xf32>
    %51 = vector.broadcast %50 : vector<2x1xf32> to vector<2x32xf32>
    %52 = arith.cmpf oeq, %34, %51 : vector<2x32xf32>
    %c32_i32_18 = arith.constant 32 : i32
    %53 = vector.broadcast %c32_i32_18 : i32 to vector<2x32xi32>
    %54 = arith.select %52, %8, %53 : vector<2x32xi1>, vector<2x32xi32>
    %cst_19 = arith.constant dense<2147483647> : vector<2xi32>
    %55 = vector.multi_reduction <minsi>, %54, %cst_19 [1] : vector<2x32xi32> to vector<2xi32>
    %56 = vector.shape_cast %55 : vector<2xi32> to vector<2x1xi32>
    %57 = vector.broadcast %56 : vector<2x1xi32> to vector<2x32xi32>
    %58 = arith.cmpi eq, %8, %57 : vector<2x32xi32>
    %59 = vector.broadcast %cst_8 : f32 to vector<2x32xf32>
    %60 = arith.select %58, %59, %34 : vector<2x32xi1>, vector<2x32xf32>
    %61 = arith.addf %35, %50 : vector<2x1xf32>
    %c2_i32 = arith.constant 2 : i32
    %cst_20 = arith.constant dense<0xFF800000> : vector<2xf32>
    %62 = vector.multi_reduction <maximumf>, %47, %cst_20 [1] : vector<2x32xf32> to vector<2xf32>
    %63 = vector.shape_cast %62 : vector<2xf32> to vector<2x1xf32>
    %64 = vector.broadcast %63 : vector<2x1xf32> to vector<2x32xf32>
    %65 = arith.cmpf oeq, %47, %64 : vector<2x32xf32>
    %c32_i32_21 = arith.constant 32 : i32
    %66 = vector.broadcast %c32_i32_21 : i32 to vector<2x32xi32>
    %67 = arith.select %65, %8, %66 : vector<2x32xi1>, vector<2x32xi32>
    %cst_22 = arith.constant dense<2147483647> : vector<2xi32>
    %68 = vector.multi_reduction <minsi>, %67, %cst_22 [1] : vector<2x32xi32> to vector<2xi32>
    %69 = vector.shape_cast %68 : vector<2xi32> to vector<2x1xi32>
    %70 = vector.broadcast %69 : vector<2x1xi32> to vector<2x32xi32>
    %71 = arith.cmpi eq, %8, %70 : vector<2x32xi32>
    %72 = vector.broadcast %cst_7 : f32 to vector<2x32xf32>
    %73 = arith.select %71, %72, %47 : vector<2x32xi1>, vector<2x32xf32>
    %74 = arith.addf %48, %63 : vector<2x1xf32>
    %cst_23 = arith.constant dense<0x7F800000> : vector<2xf32>
    %75 = vector.multi_reduction <minimumf>, %60, %cst_23 [1] : vector<2x32xf32> to vector<2xf32>
    %76 = vector.shape_cast %75 : vector<2xf32> to vector<2x1xf32>
    %77 = vector.broadcast %76 : vector<2x1xf32> to vector<2x32xf32>
    %78 = arith.cmpf oeq, %60, %77 : vector<2x32xf32>
    %c32_i32_24 = arith.constant 32 : i32
    %79 = vector.broadcast %c32_i32_24 : i32 to vector<2x32xi32>
    %80 = arith.select %78, %8, %79 : vector<2x32xi1>, vector<2x32xi32>
    %cst_25 = arith.constant dense<2147483647> : vector<2xi32>
    %81 = vector.multi_reduction <minsi>, %80, %cst_25 [1] : vector<2x32xi32> to vector<2xi32>
    %82 = vector.shape_cast %81 : vector<2xi32> to vector<2x1xi32>
    %83 = vector.broadcast %82 : vector<2x1xi32> to vector<2x32xi32>
    %84 = arith.cmpi eq, %8, %83 : vector<2x32xi32>
    %85 = vector.broadcast %cst_8 : f32 to vector<2x32xf32>
    %86 = arith.select %84, %85, %60 : vector<2x32xi1>, vector<2x32xf32>
    %87 = arith.addf %61, %76 : vector<2x1xf32>
    %c3_i32 = arith.constant 3 : i32
    %cst_26 = arith.constant dense<0xFF800000> : vector<2xf32>
    %88 = vector.multi_reduction <maximumf>, %73, %cst_26 [1] : vector<2x32xf32> to vector<2xf32>
    %89 = vector.shape_cast %88 : vector<2xf32> to vector<2x1xf32>
    %90 = vector.broadcast %89 : vector<2x1xf32> to vector<2x32xf32>
    %91 = arith.cmpf oeq, %73, %90 : vector<2x32xf32>
    %c32_i32_27 = arith.constant 32 : i32
    %92 = vector.broadcast %c32_i32_27 : i32 to vector<2x32xi32>
    %93 = arith.select %91, %8, %92 : vector<2x32xi1>, vector<2x32xi32>
    %cst_28 = arith.constant dense<2147483647> : vector<2xi32>
    %94 = vector.multi_reduction <minsi>, %93, %cst_28 [1] : vector<2x32xi32> to vector<2xi32>
    %95 = vector.shape_cast %94 : vector<2xi32> to vector<2x1xi32>
    %96 = vector.broadcast %95 : vector<2x1xi32> to vector<2x32xi32>
    %97 = arith.cmpi eq, %8, %96 : vector<2x32xi32>
    %98 = vector.broadcast %cst_7 : f32 to vector<2x32xf32>
    %99 = arith.select %97, %98, %73 : vector<2x32xi1>, vector<2x32xf32>
    %100 = arith.addf %74, %89 : vector<2x1xf32>
    %cst_29 = arith.constant dense<0x7F800000> : vector<2xf32>
    %101 = vector.multi_reduction <minimumf>, %86, %cst_29 [1] : vector<2x32xf32> to vector<2xf32>
    %102 = vector.shape_cast %101 : vector<2xf32> to vector<2x1xf32>
    %103 = vector.broadcast %102 : vector<2x1xf32> to vector<2x32xf32>
    %104 = arith.cmpf oeq, %86, %103 : vector<2x32xf32>
    %c32_i32_30 = arith.constant 32 : i32
    %105 = vector.broadcast %c32_i32_30 : i32 to vector<2x32xi32>
    %106 = arith.select %104, %8, %105 : vector<2x32xi1>, vector<2x32xi32>
    %cst_31 = arith.constant dense<2147483647> : vector<2xi32>
    %107 = vector.multi_reduction <minsi>, %106, %cst_31 [1] : vector<2x32xi32> to vector<2xi32>
    %108 = vector.shape_cast %107 : vector<2xi32> to vector<2x1xi32>
    %109 = vector.broadcast %108 : vector<2x1xi32> to vector<2x32xi32>
    %110 = arith.cmpi eq, %8, %109 : vector<2x32xi32>
    %111 = vector.broadcast %cst_8 : f32 to vector<2x32xf32>
    %112 = arith.select %110, %111, %86 : vector<2x32xi1>, vector<2x32xf32>
    %113 = arith.addf %87, %102 : vector<2x1xf32>
    %c4_i32 = arith.constant 4 : i32
    %cst_32 = arith.constant dense<0xFF800000> : vector<2xf32>
    %114 = vector.multi_reduction <maximumf>, %99, %cst_32 [1] : vector<2x32xf32> to vector<2xf32>
    %115 = vector.shape_cast %114 : vector<2xf32> to vector<2x1xf32>
    %116 = vector.broadcast %115 : vector<2x1xf32> to vector<2x32xf32>
    %117 = arith.cmpf oeq, %99, %116 : vector<2x32xf32>
    %c32_i32_33 = arith.constant 32 : i32
    %118 = vector.broadcast %c32_i32_33 : i32 to vector<2x32xi32>
    %119 = arith.select %117, %8, %118 : vector<2x32xi1>, vector<2x32xi32>
    %cst_34 = arith.constant dense<2147483647> : vector<2xi32>
    %120 = vector.multi_reduction <minsi>, %119, %cst_34 [1] : vector<2x32xi32> to vector<2xi32>
    %121 = vector.shape_cast %120 : vector<2xi32> to vector<2x1xi32>
    %122 = vector.broadcast %121 : vector<2x1xi32> to vector<2x32xi32>
    %123 = arith.cmpi eq, %8, %122 : vector<2x32xi32>
    %124 = vector.broadcast %cst_7 : f32 to vector<2x32xf32>
    %125 = arith.select %123, %124, %99 : vector<2x32xi1>, vector<2x32xf32>
    %126 = arith.addf %100, %115 : vector<2x1xf32>
    %cst_35 = arith.constant dense<0x7F800000> : vector<2xf32>
    %127 = vector.multi_reduction <minimumf>, %112, %cst_35 [1] : vector<2x32xf32> to vector<2xf32>
    %128 = vector.shape_cast %127 : vector<2xf32> to vector<2x1xf32>
    %129 = vector.broadcast %128 : vector<2x1xf32> to vector<2x32xf32>
    %130 = arith.cmpf oeq, %112, %129 : vector<2x32xf32>
    %c32_i32_36 = arith.constant 32 : i32
    %131 = vector.broadcast %c32_i32_36 : i32 to vector<2x32xi32>
    %132 = arith.select %130, %8, %131 : vector<2x32xi1>, vector<2x32xi32>
    %cst_37 = arith.constant dense<2147483647> : vector<2xi32>
    %133 = vector.multi_reduction <minsi>, %132, %cst_37 [1] : vector<2x32xi32> to vector<2xi32>
    %134 = vector.shape_cast %133 : vector<2xi32> to vector<2x1xi32>
    %135 = vector.broadcast %134 : vector<2x1xi32> to vector<2x32xi32>
    %136 = arith.cmpi eq, %8, %135 : vector<2x32xi32>
    %137 = vector.broadcast %cst_8 : f32 to vector<2x32xf32>
    %138 = arith.select %136, %137, %112 : vector<2x32xi1>, vector<2x32xf32>
    %139 = arith.addf %113, %128 : vector<2x1xf32>
    %c5_i32 = arith.constant 5 : i32
    %cst_38 = arith.constant dense<0xFF800000> : vector<2xf32>
    %140 = vector.multi_reduction <maximumf>, %125, %cst_38 [1] : vector<2x32xf32> to vector<2xf32>
    %141 = vector.shape_cast %140 : vector<2xf32> to vector<2x1xf32>
    %142 = vector.broadcast %141 : vector<2x1xf32> to vector<2x32xf32>
    %143 = arith.cmpf oeq, %125, %142 : vector<2x32xf32>
    %c32_i32_39 = arith.constant 32 : i32
    %144 = vector.broadcast %c32_i32_39 : i32 to vector<2x32xi32>
    %145 = arith.select %143, %8, %144 : vector<2x32xi1>, vector<2x32xi32>
    %cst_40 = arith.constant dense<2147483647> : vector<2xi32>
    %146 = vector.multi_reduction <minsi>, %145, %cst_40 [1] : vector<2x32xi32> to vector<2xi32>
    %147 = vector.shape_cast %146 : vector<2xi32> to vector<2x1xi32>
    %148 = vector.broadcast %147 : vector<2x1xi32> to vector<2x32xi32>
    %149 = arith.cmpi eq, %8, %148 : vector<2x32xi32>
    %150 = vector.broadcast %cst_7 : f32 to vector<2x32xf32>
    %151 = arith.select %149, %150, %125 : vector<2x32xi1>, vector<2x32xf32>
    %152 = arith.addf %126, %141 : vector<2x1xf32>
    %cst_41 = arith.constant dense<0x7F800000> : vector<2xf32>
    %153 = vector.multi_reduction <minimumf>, %138, %cst_41 [1] : vector<2x32xf32> to vector<2xf32>
    %154 = vector.shape_cast %153 : vector<2xf32> to vector<2x1xf32>
    %155 = vector.broadcast %154 : vector<2x1xf32> to vector<2x32xf32>
    %156 = arith.cmpf oeq, %138, %155 : vector<2x32xf32>
    %c32_i32_42 = arith.constant 32 : i32
    %157 = vector.broadcast %c32_i32_42 : i32 to vector<2x32xi32>
    %158 = arith.select %156, %8, %157 : vector<2x32xi1>, vector<2x32xi32>
    %cst_43 = arith.constant dense<2147483647> : vector<2xi32>
    %159 = vector.multi_reduction <minsi>, %158, %cst_43 [1] : vector<2x32xi32> to vector<2xi32>
    %160 = vector.shape_cast %159 : vector<2xi32> to vector<2x1xi32>
    %161 = vector.broadcast %160 : vector<2x1xi32> to vector<2x32xi32>
    %162 = arith.cmpi eq, %8, %161 : vector<2x32xi32>
    %163 = vector.broadcast %cst_8 : f32 to vector<2x32xf32>
    %164 = arith.select %162, %163, %138 : vector<2x32xi1>, vector<2x32xf32>
    %165 = arith.addf %139, %154 : vector<2x1xf32>
    %c6_i32 = arith.constant 6 : i32
    %cst_44 = arith.constant dense<0xFF800000> : vector<2xf32>
    %166 = vector.multi_reduction <maximumf>, %151, %cst_44 [1] : vector<2x32xf32> to vector<2xf32>
    %167 = vector.shape_cast %166 : vector<2xf32> to vector<2x1xf32>
    %168 = vector.broadcast %167 : vector<2x1xf32> to vector<2x32xf32>
    %169 = arith.cmpf oeq, %151, %168 : vector<2x32xf32>
    %c32_i32_45 = arith.constant 32 : i32
    %170 = vector.broadcast %c32_i32_45 : i32 to vector<2x32xi32>
    %171 = arith.select %169, %8, %170 : vector<2x32xi1>, vector<2x32xi32>
    %cst_46 = arith.constant dense<2147483647> : vector<2xi32>
    %172 = vector.multi_reduction <minsi>, %171, %cst_46 [1] : vector<2x32xi32> to vector<2xi32>
    %173 = vector.shape_cast %172 : vector<2xi32> to vector<2x1xi32>
    %174 = vector.broadcast %173 : vector<2x1xi32> to vector<2x32xi32>
    %175 = arith.cmpi eq, %8, %174 : vector<2x32xi32>
    %176 = vector.broadcast %cst_7 : f32 to vector<2x32xf32>
    %177 = arith.select %175, %176, %151 : vector<2x32xi1>, vector<2x32xf32>
    %178 = arith.addf %152, %167 : vector<2x1xf32>
    %cst_47 = arith.constant dense<0x7F800000> : vector<2xf32>
    %179 = vector.multi_reduction <minimumf>, %164, %cst_47 [1] : vector<2x32xf32> to vector<2xf32>
    %180 = vector.shape_cast %179 : vector<2xf32> to vector<2x1xf32>
    %181 = vector.broadcast %180 : vector<2x1xf32> to vector<2x32xf32>
    %182 = arith.cmpf oeq, %164, %181 : vector<2x32xf32>
    %c32_i32_48 = arith.constant 32 : i32
    %183 = vector.broadcast %c32_i32_48 : i32 to vector<2x32xi32>
    %184 = arith.select %182, %8, %183 : vector<2x32xi1>, vector<2x32xi32>
    %cst_49 = arith.constant dense<2147483647> : vector<2xi32>
    %185 = vector.multi_reduction <minsi>, %184, %cst_49 [1] : vector<2x32xi32> to vector<2xi32>
    %186 = vector.shape_cast %185 : vector<2xi32> to vector<2x1xi32>
    %187 = vector.broadcast %186 : vector<2x1xi32> to vector<2x32xi32>
    %188 = arith.cmpi eq, %8, %187 : vector<2x32xi32>
    %189 = vector.broadcast %cst_8 : f32 to vector<2x32xf32>
    %190 = arith.select %188, %189, %164 : vector<2x32xi1>, vector<2x32xf32>
    %191 = arith.addf %165, %180 : vector<2x1xf32>
    %c7_i32 = arith.constant 7 : i32
    %cst_50 = arith.constant dense<0xFF800000> : vector<2xf32>
    %192 = vector.multi_reduction <maximumf>, %177, %cst_50 [1] : vector<2x32xf32> to vector<2xf32>
    %193 = vector.shape_cast %192 : vector<2xf32> to vector<2x1xf32>
    %194 = vector.broadcast %193 : vector<2x1xf32> to vector<2x32xf32>
    %195 = arith.cmpf oeq, %177, %194 : vector<2x32xf32>
    %c32_i32_51 = arith.constant 32 : i32
    %196 = vector.broadcast %c32_i32_51 : i32 to vector<2x32xi32>
    %197 = arith.select %195, %8, %196 : vector<2x32xi1>, vector<2x32xi32>
    %cst_52 = arith.constant dense<2147483647> : vector<2xi32>
    %198 = vector.multi_reduction <minsi>, %197, %cst_52 [1] : vector<2x32xi32> to vector<2xi32>
    %199 = vector.shape_cast %198 : vector<2xi32> to vector<2x1xi32>
    %200 = vector.broadcast %199 : vector<2x1xi32> to vector<2x32xi32>
    %201 = arith.cmpi eq, %8, %200 : vector<2x32xi32>
    %202 = vector.broadcast %cst_7 : f32 to vector<2x32xf32>
    %203 = arith.select %201, %202, %177 : vector<2x32xi1>, vector<2x32xf32>
    %204 = arith.addf %178, %193 : vector<2x1xf32>
    %cst_53 = arith.constant dense<0x7F800000> : vector<2xf32>
    %205 = vector.multi_reduction <minimumf>, %190, %cst_53 [1] : vector<2x32xf32> to vector<2xf32>
    %206 = vector.shape_cast %205 : vector<2xf32> to vector<2x1xf32>
    %207 = vector.broadcast %206 : vector<2x1xf32> to vector<2x32xf32>
    %208 = arith.cmpf oeq, %190, %207 : vector<2x32xf32>
    %c32_i32_54 = arith.constant 32 : i32
    %209 = vector.broadcast %c32_i32_54 : i32 to vector<2x32xi32>
    %210 = arith.select %208, %8, %209 : vector<2x32xi1>, vector<2x32xi32>
    %cst_55 = arith.constant dense<2147483647> : vector<2xi32>
    %211 = vector.multi_reduction <minsi>, %210, %cst_55 [1] : vector<2x32xi32> to vector<2xi32>
    %212 = vector.shape_cast %211 : vector<2xi32> to vector<2x1xi32>
    %213 = vector.broadcast %212 : vector<2x1xi32> to vector<2x32xi32>
    %214 = arith.cmpi eq, %8, %213 : vector<2x32xi32>
    %215 = vector.broadcast %cst_8 : f32 to vector<2x32xf32>
    %216 = arith.select %214, %215, %190 : vector<2x32xi1>, vector<2x32xf32>
    %217 = arith.addf %191, %206 : vector<2x1xf32>
    %c8_i32 = arith.constant 8 : i32
    %cst_56 = arith.constant dense<0xFF800000> : vector<2xf32>
    %218 = vector.multi_reduction <maximumf>, %203, %cst_56 [1] : vector<2x32xf32> to vector<2xf32>
    %219 = vector.shape_cast %218 : vector<2xf32> to vector<2x1xf32>
    %220 = vector.broadcast %219 : vector<2x1xf32> to vector<2x32xf32>
    %221 = arith.cmpf oeq, %203, %220 : vector<2x32xf32>
    %c32_i32_57 = arith.constant 32 : i32
    %222 = vector.broadcast %c32_i32_57 : i32 to vector<2x32xi32>
    %223 = arith.select %221, %8, %222 : vector<2x32xi1>, vector<2x32xi32>
    %cst_58 = arith.constant dense<2147483647> : vector<2xi32>
    %224 = vector.multi_reduction <minsi>, %223, %cst_58 [1] : vector<2x32xi32> to vector<2xi32>
    %225 = vector.shape_cast %224 : vector<2xi32> to vector<2x1xi32>
    %226 = vector.broadcast %225 : vector<2x1xi32> to vector<2x32xi32>
    %227 = arith.cmpi eq, %8, %226 : vector<2x32xi32>
    %228 = vector.broadcast %cst_7 : f32 to vector<2x32xf32>
    %229 = arith.select %227, %228, %203 : vector<2x32xi1>, vector<2x32xf32>
    %230 = arith.addf %204, %219 : vector<2x1xf32>
    %cst_59 = arith.constant dense<0x7F800000> : vector<2xf32>
    %231 = vector.multi_reduction <minimumf>, %216, %cst_59 [1] : vector<2x32xf32> to vector<2xf32>
    %232 = vector.shape_cast %231 : vector<2xf32> to vector<2x1xf32>
    %233 = vector.broadcast %232 : vector<2x1xf32> to vector<2x32xf32>
    %234 = arith.cmpf oeq, %216, %233 : vector<2x32xf32>
    %c32_i32_60 = arith.constant 32 : i32
    %235 = vector.broadcast %c32_i32_60 : i32 to vector<2x32xi32>
    %236 = arith.select %234, %8, %235 : vector<2x32xi1>, vector<2x32xi32>
    %cst_61 = arith.constant dense<2147483647> : vector<2xi32>
    %237 = vector.multi_reduction <minsi>, %236, %cst_61 [1] : vector<2x32xi32> to vector<2xi32>
    %238 = vector.shape_cast %237 : vector<2xi32> to vector<2x1xi32>
    %239 = vector.broadcast %238 : vector<2x1xi32> to vector<2x32xi32>
    %240 = arith.cmpi eq, %8, %239 : vector<2x32xi32>
    %241 = vector.broadcast %cst_8 : f32 to vector<2x32xf32>
    %242 = arith.select %240, %241, %216 : vector<2x32xi1>, vector<2x32xf32>
    %243 = arith.addf %217, %232 : vector<2x1xf32>
    %c9_i32 = arith.constant 9 : i32
    %cst_62 = arith.constant dense<0xFF800000> : vector<2xf32>
    %244 = vector.multi_reduction <maximumf>, %229, %cst_62 [1] : vector<2x32xf32> to vector<2xf32>
    %245 = vector.shape_cast %244 : vector<2xf32> to vector<2x1xf32>
    %246 = vector.broadcast %245 : vector<2x1xf32> to vector<2x32xf32>
    %247 = arith.cmpf oeq, %229, %246 : vector<2x32xf32>
    %c32_i32_63 = arith.constant 32 : i32
    %248 = vector.broadcast %c32_i32_63 : i32 to vector<2x32xi32>
    %249 = arith.select %247, %8, %248 : vector<2x32xi1>, vector<2x32xi32>
    %cst_64 = arith.constant dense<2147483647> : vector<2xi32>
    %250 = vector.multi_reduction <minsi>, %249, %cst_64 [1] : vector<2x32xi32> to vector<2xi32>
    %251 = vector.shape_cast %250 : vector<2xi32> to vector<2x1xi32>
    %252 = vector.broadcast %251 : vector<2x1xi32> to vector<2x32xi32>
    %253 = arith.cmpi eq, %8, %252 : vector<2x32xi32>
    %254 = vector.broadcast %cst_7 : f32 to vector<2x32xf32>
    %255 = arith.select %253, %254, %229 : vector<2x32xi1>, vector<2x32xf32>
    %256 = arith.addf %230, %245 : vector<2x1xf32>
    %cst_65 = arith.constant dense<0x7F800000> : vector<2xf32>
    %257 = vector.multi_reduction <minimumf>, %242, %cst_65 [1] : vector<2x32xf32> to vector<2xf32>
    %258 = vector.shape_cast %257 : vector<2xf32> to vector<2x1xf32>
    %259 = vector.broadcast %258 : vector<2x1xf32> to vector<2x32xf32>
    %260 = arith.cmpf oeq, %242, %259 : vector<2x32xf32>
    %c32_i32_66 = arith.constant 32 : i32
    %261 = vector.broadcast %c32_i32_66 : i32 to vector<2x32xi32>
    %262 = arith.select %260, %8, %261 : vector<2x32xi1>, vector<2x32xi32>
    %cst_67 = arith.constant dense<2147483647> : vector<2xi32>
    %263 = vector.multi_reduction <minsi>, %262, %cst_67 [1] : vector<2x32xi32> to vector<2xi32>
    %264 = vector.shape_cast %263 : vector<2xi32> to vector<2x1xi32>
    %265 = vector.broadcast %264 : vector<2x1xi32> to vector<2x32xi32>
    %266 = arith.cmpi eq, %8, %265 : vector<2x32xi32>
    %267 = vector.broadcast %cst_8 : f32 to vector<2x32xf32>
    %268 = arith.select %266, %267, %242 : vector<2x32xi1>, vector<2x32xf32>
    %269 = arith.addf %243, %258 : vector<2x1xf32>
    %270 = arith.addf %256, %269 : vector<2x1xf32>
    %cst_68 = arith.constant 5.000000e-02 : f32
    %271 = vector.broadcast %cst_68 : f32 to vector<2x1xf32>
    %272 = arith.mulf %270, %271 : vector<2x1xf32>
    %273 = arith.negf %272 : vector<2x1xf32>
    %274 = math.exp %273 : vector<2x1xf32>
    %cst_69 = arith.constant 1.000000e+00 : f32
    %275 = vector.broadcast %cst_69 : f32 to vector<2x1xf32>
    %276 = arith.addf %275, %274 : vector<2x1xf32>
    %277 = arith.divf %275, %276 : vector<2x1xf32>
    %c0_70 = arith.constant 0 : index
    %c0_71 = arith.constant 0 : index
    %278 = vector.load %arg4[%c0_70, %c0_71] : memref<2x1xf32, #tpu.memory_space<vmem>>, vector<2x1xf32>
    tpu.vector_store %arg4[%c0_70, %c0_71], %277 {strides = array<i32>} : memref<2x1xf32, #tpu.memory_space<vmem>>, vector<2x1xf32>,
    return
  }
  func.func @transform_0(%arg0: i32) -> (i32, i32, i32) {
    %c0_i32 = arith.constant 0 : i32
    %c0_i32_0 = arith.constant 0 : i32
    %c0_i32_1 = arith.constant 0 : i32
    return %arg0, %c0_i32, %c0_i32_0 : i32, i32, i32
  }
  func.func @transform_1(%arg0: i32) -> (i32, i32) {
    %c0_i32 = arith.constant 0 : i32
    %c0_i32_0 = arith.constant 0 : i32
    %c0_i32_1 = arith.constant 0 : i32
    return %c0_i32, %c0_i32_0 : i32, i32
  }
  func.func @transform_2(%arg0: i32) -> (i32, i32) {
    %c0_i32 = arith.constant 0 : i32
    %c0_i32_0 = arith.constant 0 : i32
    %c0_i32_1 = arith.constant 0 : i32
    return %c0_i32, %c0_i32_0 : i32, i32
  }
  func.func @transform_3(%arg0: i32) -> (i32, i32) {
    %c0_i32 = arith.constant 0 : i32
    %c0_i32_0 = arith.constant 0 : i32
    return %arg0, %c0_i32 : i32, i32
  }
}

</mosaic_0001>

<bundles_post_ra>
// kernel: tpu_custom_call.1
= control target key start
LH: loop header
LB: loop body
LE: loop exit
PB: predicated region body
PF: predicated region fallthrough
CT: control target
= control target key end

     0   :  { %v795_v25 = vmov 0   ;;  %v85_v43 = vlaneseq  ;;  %vm122_vm0 = vcmask 130112   ;;  %vm126_vm1 = vcmask 195712   ;;  %s1138_s1 = inlined_call_operand.vmem [shape: f32[128,1], index: 1, kind: input, shape index: {}]   ;;  %s1139_s2 = inlined_call_operand.<no memory space> [shape: f32[1,1], index: 2, kind: input, shape index: {}]   ;;  %s1140_s0 = inlined_call_operand.vmem [shape: f32[2,32,128], index: 0, kind: input, shape index: {}]   ;;  %s1141_s3 = inlined_call_operand.vmem [shape: f32[2,1], index: 3, kind: output, shape index: {}]  }
   0x1   :  { %v39_v0 = vld [vmem:[%s1138_s1 + $0x78] sm:$0xff]  ;;  %v38_v1 = vld [vmem:[%s1138_s1 + $0x70] sm:$0xff]  ;;  %v37_v2 = vld [vmem:[%s1138_s1 + $0x68] sm:$0xff]  ;;  %v8_v7 = vstv %s1139_s2  ;;  %782 = vset.pattern.permute.xlu0 %v795_v25  ;;  %784 = vset.pattern.permute.xlu1 %v795_v25  ;;  %vm130_vm2 = vcmask 261312   ;;  %vm139_vm3 = vcmask 1041409   ;;  %vm142_vm4 = vcmask 254976  }
   0x2   :  { %44 = vmatpush.msra.mxu0 %v39_v0  ;;  %734 = vmatpush.msra.mxu2 %v39_v0  ;;  %v36_v3 = vld [vmem:[%s1138_s1 + $0x60] sm:$0xff]  ;;  %v35_v4 = vld [vmem:[%s1138_s1 + $0x58] sm:$0xff]  ;;  %v34_v5 = vld [vmem:[%s1138_s1 + $0x50] sm:$0xff]  ;;  %9 = vst [vmem:[#allocation2] sm:$0x1] %v8_v7  ;;  %v160_v44 = vshrl.u32 %v85_v43, 7 }
   0x3   :  { %733 = vmatpush.msra.mxu1 %v39_v0  ;;  %735 = vmatpush.msra.mxu3 %v39_v0  ;;  %v33_v6 = vld [vmem:[%s1138_s1 + $0x48] sm:$0xff]  ;;  %v32_v8 = vld [vmem:[%s1138_s1 + $0x40] sm:$0xff]  ;;  %v31_v9 = vld [vmem:[%s1138_s1 + $0x38] sm:$0xff]  ;;  %v915_v45 = vand.u32 127, %v85_v43 }
   0x4   :  { %45 = vmatpush.msra.mxu0 %v38_v1  ;;  %737 = vmatpush.msra.mxu2 %v38_v1  ;;  %v30_v10 = vld [vmem:[%s1138_s1 + $0x30] sm:$0xff]  ;;  %v29_v11 = vld [vmem:[%s1138_s1 + $0x28] sm:$0xff]  ;;  %v28_v12 = vld [vmem:[%s1138_s1 + $0x20] sm:$0xff]  ;;  %v167_v46 = vadd.s32 8, %v160_v44  ;;  %v173_v47 = vadd.s32 16, %v160_v44  ;;  %v179_v48 = vadd.s32 24, %v160_v44 }
   0x5   :  { %736 = vmatpush.msra.mxu1 %v38_v1  ;;  %738 = vmatpush.msra.mxu3 %v38_v1  ;;  %v27_v13 = vld [vmem:[%s1138_s1 + $0x18] sm:$0xff]  ;;  %v26_v14 = vld [vmem:[%s1138_s1 + $0x10] sm:$0xff]  ;;  %v25_v15 = vld [vmem:[%s1138_s1 + $0x8] sm:$0xff]  ;;  %v922_v53 = vadd.s32 4294967288, %v915_v45  ;;  %v927_v57 = vadd.s32 4294967272, %v915_v45  ;;  %v930_v58 = vadd.s32 4294967280, %v915_v45 }
   0x6   :  { %46 = vmatpush.msra.mxu0 %v37_v2  ;;  %740 = vmatpush.msra.mxu2 %v37_v2  ;;  %v24_v16 = vld [vmem:[%s1138_s1] sm:$0xff]  ;;  %v18_v19 = vld [vmem:[%s1140_s0 + $0x10] sm:$0xff]  ;;  %v17_v21 = vld [vmem:[%s1140_s0 + $0x8] sm:$0xff] }
   0x7   :  { %739 = vmatpush.msra.mxu1 %v37_v2  ;;  %741 = vmatpush.msra.mxu3 %v37_v2  ;;  %v16_v17 = vld [vmem:[%s1140_s0] sm:$0xff]  ;;  %v22_v20 = vld [vmem:[%s1140_s0 + $0x30] sm:$0xff]  ;;  %v21_v22 = vld [vmem:[%s1140_s0 + $0x28] sm:$0xff] }
   0x8   :  { %47 = vmatpush.msra.mxu0 %v36_v3  ;;  %743 = vmatpush.msra.mxu2 %v36_v3  ;;  %v20_v18 = vld [vmem:[%s1140_s0 + $0x20] sm:$0xff]  ;;  %v19_v23 = vld [vmem:[%s1140_s0 + $0x18] sm:$0xff] }
   0x9   :  { %742 = vmatpush.msra.mxu1 %v36_v3  ;;  %744 = vmatpush.msra.mxu3 %v36_v3  ;;  %v23_v24 = vld [vmem:[%s1140_s0 + $0x38] sm:$0xff]  ;;  %v790_v26 = vld [vmem:[#allocation2] ss:$0 sm:$0xff] }
   0xa   :  { %48 = vmatpush.msra.mxu0 %v35_v4  ;;  %746 = vmatpush.msra.mxu2 %v35_v4 }
   0xb   :  { %745 = vmatpush.msra.mxu1 %v35_v4  ;;  %747 = vmatpush.msra.mxu3 %v35_v4 }
   0xc   :  { %49 = vmatpush.msra.mxu0 %v34_v5  ;;  %749 = vmatpush.msra.mxu2 %v34_v5 }
   0xd   :  { %748 = vmatpush.msra.mxu1 %v34_v5  ;;  %750 = vmatpush.msra.mxu3 %v34_v5 }
   0xe   :  { %50 = vmatpush.msra.mxu0 %v33_v6  ;;  %752 = vmatpush.msra.mxu2 %v33_v6 }
   0xf   :  { %751 = vmatpush.msra.mxu1 %v33_v6  ;;  %753 = vmatpush.msra.mxu3 %v33_v6 }
  0x10   :  { %51 = vmatpush.msra.mxu0 %v32_v8  ;;  %755 = vmatpush.msra.mxu2 %v32_v8 }
  0x11   :  { %754 = vmatpush.msra.mxu1 %v32_v8  ;;  %756 = vmatpush.msra.mxu3 %v32_v8 }
  0x12   :  { %52 = vmatpush.msra.mxu0 %v31_v9  ;;  %758 = vmatpush.msra.mxu2 %v31_v9 }
  0x13   :  { %757 = vmatpush.msra.mxu1 %v31_v9  ;;  %759 = vmatpush.msra.mxu3 %v31_v9 }
  0x14   :  { %53 = vmatpush.msra.mxu0 %v30_v10  ;;  %761 = vmatpush.msra.mxu2 %v30_v10 }
  0x15   :  { %760 = vmatpush.msra.mxu1 %v30_v10  ;;  %762 = vmatpush.msra.mxu3 %v30_v10 }
  0x16   :  { %54 = vmatpush.msra.mxu0 %v29_v11  ;;  %764 = vmatpush.msra.mxu2 %v29_v11 }
  0x17   :  { %763 = vmatpush.msra.mxu1 %v29_v11  ;;  %765 = vmatpush.msra.mxu3 %v29_v11 }
  0x18   :  { %55 = vmatpush.msra.mxu0 %v28_v12  ;;  %767 = vmatpush.msra.mxu2 %v28_v12 }
  0x19   :  { %766 = vmatpush.msra.mxu1 %v28_v12  ;;  %768 = vmatpush.msra.mxu3 %v28_v12 }
  0x1a   :  { %56 = vmatpush.msra.mxu0 %v27_v13  ;;  %770 = vmatpush.msra.mxu2 %v27_v13 }
  0x1b   :  { %769 = vmatpush.msra.mxu1 %v27_v13  ;;  %771 = vmatpush.msra.mxu3 %v27_v13 }
  0x1c   :  { %57 = vmatpush.msra.mxu0 %v26_v14  ;;  %773 = vmatpush.msra.mxu2 %v26_v14 }
  0x1d   :  { %772 = vmatpush.msra.mxu1 %v26_v14  ;;  %774 = vmatpush.msra.mxu3 %v26_v14 }
  0x1e   :  { %58 = vmatpush.msra.mxu0 %v25_v15  ;;  %776 = vmatpush.msra.mxu2 %v25_v15 }
  0x1f   :  { %775 = vmatpush.msra.mxu1 %v25_v15  ;;  %777 = vmatpush.msra.mxu3 %v25_v15 }
  0x20   :  { %59 = vmatpush.msra.mxu0 %v24_v16  ;;  %779 = vmatpush.msra.mxu2 %v24_v16 }
  0x21   :  { %60 = vmatmul.f32.vlgmr.msra.gmra.mxu0 %v16_v17  ;;  %72 = vmatmul.f32.vlgmr.msra.gmra.mxu2 %v20_v18 }
  0x22   :  { %778 = vmatpush.msra.mxu1 %v24_v16  ;;  %780 = vmatpush.msra.mxu3 %v24_v16 }
  0x23   :  { %66 = vmatmul.f32.vlgmr.msra.gmra.mxu1 %v18_v19  ;;  %78 = vmatmul.f32.vlgmr.msra.gmra.mxu3 %v22_v20 }
  0x24   :  { %783 = vset.pattern.permute.xlu2 %v795_v25 }
  0x29   :  { %63 = vmatmul.f32.gmra.mxu0 %v17_v21  ;;  %75 = vmatmul.f32.gmra.mxu2 %v21_v22 }
  0x2b   :  { %69 = vmatmul.f32.gmra.mxu1 %v19_v23  ;;  %81 = vmatmul.f32.gmra.mxu3 %v23_v24 }
  0x9e   :  { %v61_v27 = vpop.f32.mrf.mxu0 }
  0x9f   :  { %v891_v28 = vadd.f32 %v790_v26, %v61_v27 }
  0xa0   :  { %v67_v29 = vpop.f32.mrf.mxu1 }
  0xa1   :  { %96 = vperm.xlu0 %782, %v891_v28   ;;  %v894_v30 = vadd.f32 %v790_v26, %v67_v29 }
  0xa3   :  { %102 = vperm.xlu2 %783, %v894_v30  }
  0xa4   :  { %v73_v31 = vpop.f32.mrf.mxu2 }
  0xa5   :  { %v897_v32 = vadd.f32 %v790_v26, %v73_v31 }
  0xa6   :  { %v64_v33 = vpop.f32.mrf.mxu0  ;;  %v79_v34 = vpop.f32.mrf.mxu3 }
  0xa7   :  { %v899_v35 = vadd.f32 %v790_v26, %v64_v33  ;;  %108 = vperm.xlu1 %784, %v897_v32   ;;  %v902_v36 = vadd.f32 %v790_v26, %v79_v34 }
  0xa8   :  { %v70_v37 = vpop.f32.mrf.mxu1 }
  0xa9   :  { %99 = vperm.xlu0 %782, %v899_v35   ;;  %v908_v40 = vadd.f32 %v790_v26, %v70_v37 }
  0xab   :  { %114 = vperm.xlu2 %783, %v902_v36  }
  0xac   :  { %v76_v38 = vpop.f32.mrf.mxu2 }
  0xad   :  { %v906_v39 = vadd.f32 %v790_v26, %v76_v38 }
  0xae   :  { %v82_v41 = vpop.f32.mrf.mxu3 }
  0xaf   :  { %111 = vperm.xlu1 %784, %v906_v39   ;;  %v912_v42 = vadd.f32 %v790_v26, %v82_v41 }
  0xb1   :  { %105 = vperm.xlu0 %782, %v908_v40  }
  0xb7   :  { %117 = vperm.xlu1 %784, %v912_v42  }
  0xbf   :  { %785 = vset.pattern.permute.xlu1 %v160_v44 }
  0xc7   :  { %163 = vperm.xlu1 %785, %v915_v45  }
  0xcf   :  { %786 = vset.pattern.permute.xlu1 %v167_v46 }
  0xd7   :  { %169 = vperm.xlu1 %786, %v915_v45  }
  0xdf   :  { %787 = vset.pattern.permute.xlu1 %v173_v47 }
  0xe7   :  { %175 = vperm.xlu1 %787, %v915_v45  }
  0xef   :  { %788 = vset.pattern.permute.xlu1 %v179_v48 }
  0xf7   :  { %181 = vperm.xlu1 %788, %v915_v45  }
  0xfd   :  { %v103_v52 = vpop.permute.xlu2 %102 }
  0xfe   :  { %v125_v2 = vperm.slane %v103_v52, %v930_v58 }
  0xff   :  { %789 = vset.pattern.permute.xlu1 %v795_v25 }
 0x105   :  { %v115_v60 = vpop.permute.xlu2 %114 }
 0x106   :  { %v135_v3 = vperm.slane %v115_v60, %v930_v58 }
 0x113   :  { %v97_v49 = vpop.permute.xlu0 %96 }
 0x114   :  { %v119_v61 = vperm.slane %v97_v49, %v915_v45 }
 0x119   :  { %v109_v50 = vpop.permute.xlu1 %108 }
 0x11a   :  { %v132_v62 = vperm.slane %v109_v50, %v915_v45 }
 0x11b   :  { %v100_v51 = vpop.permute.xlu0 %99 }
 0x11c   :  { %v121_v55 = vperm.slane %v100_v51, %v922_v53 }
 0x11e   :  { %v123_v63 = vsel %vm122_vm0, %v121_v55, %v119_v61 }
 0x11f   :  { %v127_v6 = vsel %vm126_vm1, %v125_v2, %v123_v63 }
 0x121   :  { %v112_v54 = vpop.permute.xlu1 %111 }
 0x122   :  { %v133_v56 = vperm.slane %v112_v54, %v922_v53 }
 0x123   :  { %v106_v59 = vpop.permute.xlu0 %105 }
 0x124   :  { %v134_v0 = vsel %vm122_vm0, %v133_v56, %v132_v62  ;;  %v129_v1 = vperm.slane %v106_v59, %v927_v57 }
 0x125   :  { %v136_v7 = vsel %vm126_vm1, %v135_v3, %v134_v0 }
 0x126   :  { %v131_v8 = vsel %vm130_vm2, %v129_v1, %v127_v6 }
 0x129   :  { %v118_v4 = vpop.permute.xlu1 %117 }
 0x12a   :  { %v137_v5 = vperm.slane %v118_v4, %v927_v57 }
 0x12c   :  { %v138_v9 = vsel %vm130_vm2, %v137_v5, %v136_v7 }
 0x12d   :  { %v945_v10 = vsel %vm139_vm3, %v138_v9, %v131_v8 }
 0x12e   :  { %v248_v11 = vsel %vm142_vm4, %v945_v10, inf  ;;  %v143_v12 = vsel %vm142_vm4, %v945_v10, -inf }
 0x12f   :  { %249 = vmin.xlane.f32.xlu0 %v248_v11  ;;  %144 = vmax.xlane.f32.xlu2 %v143_v12 }
 0x139   :  { %v164_v13 = vpop.permute.xlu1 %163 }
 0x149   :  { %v170_v18 = vpop.permute.xlu1 %169 }
 0x159   :  { %v176_v27 = vpop.permute.xlu1 %175 }
 0x169   :  { %v182_v33 = vpop.permute.xlu1 %181 }
 0x1a2   :  { %v951_v14 = vpop.xlane.xlu2 %144  ;;  %v955_v17 = vpop.xlane.xlu0 %249 }
 0x1a3   :  { %v147_v15 = vperm.slane %v951_v14, 0  ;;  %v148_v16 = vperm.slane %v951_v14, 1  ;;  %v253_v22 = vperm.slane %v955_v17, 1  ;;  %v252_v25 = vperm.slane %v955_v17, 0 }
 0x1a5   :  { %vm156_vm5 = vcmp.eq.f32.partialorder %v906_v39, %v148_v16  ;;  %vm152_vm6 = vcmp.eq.f32.partialorder %v899_v35, %v147_v15  ;;  %vm151_vm7 = vcmp.eq.f32.partialorder %v891_v28, %v147_v15  ;;  %vm261_vm8 = vcmp.eq.f32.partialorder %v906_v39, %v253_v22 }
 0x1a6   :  { %v188_v19 = vsel %vm156_vm5, %v170_v18, 32  ;;  %v184_v20 = vsel %vm152_vm6, %v170_v18, 32  ;;  %v183_v21 = vsel %vm151_vm7, %v164_v13, 32  ;;  %vm260_vm9 = vcmp.eq.f32.partialorder %v897_v32, %v253_v22 }
 0x1a7   :  { %207 = vperm.xlu0 %782, %v188_v19   ;;  %195 = vperm.xlu2 %783, %v184_v20   ;;  %vm155_vm10 = vcmp.eq.f32.partialorder %v897_v32, %v148_v16  ;;  %v269_v23 = vsel %vm261_vm8, %v170_v18, 32  ;;  %v268_v24 = vsel %vm260_vm9, %v164_v13, 32  ;;  %vm258_vm11 = vcmp.eq.f32.partialorder %v894_v30, %v252_v25 }
 0x1a8   :  { %192 = vperm.xlu1 %789, %v183_v21   ;;  %v187_v26 = vsel %vm155_vm10, %v164_v13, 32  ;;  %vm157_vm12 = vcmp.eq.f32.partialorder %v902_v36, %v148_v16  ;;  %vm256_vm13 = vcmp.eq.f32.partialorder %v891_v28, %v252_v25  ;;  %v266_v29 = vsel %vm258_vm11, %v176_v27, 32 }
 0x1a9   :  { %v189_v31 = vsel %vm157_vm12, %v176_v27, 32  ;;  %v264_v32 = vsel %vm256_vm13, %v164_v13, 32  ;;  %vm158_vm14 = vcmp.eq.f32.partialorder %v912_v42, %v148_v16  ;;  %vm154_vm15 = vcmp.eq.f32.partialorder %v908_v40, %v147_v15 }
 0x1aa   :  { %vm257_vm5 = vcmp.eq.f32.partialorder %v899_v35, %v252_v25  ;;  %v190_v34 = vsel %vm158_vm14, %v182_v33, 32  ;;  %v186_v37 = vsel %vm154_vm15, %v182_v33, 32  ;;  %vm263_vm6 = vcmp.eq.f32.partialorder %v912_v42, %v253_v22 }
 0x1ab   :  { %v265_v38 = vsel %vm257_vm5, %v170_v18, 32  ;;  %vm153_vm7 = vcmp.eq.f32.partialorder %v894_v30, %v147_v15  ;;  %v271_v28 = vsel %vm263_vm6, %v182_v33, 32  ;;  %vm262_vm8 = vcmp.eq.f32.partialorder %v902_v36, %v253_v22 }
 0x1ac   :  { %v185_v39 = vsel %vm153_vm7, %v176_v27, 32  ;;  %v270_v41 = vsel %vm262_vm8, %v176_v27, 32  ;;  %vm259_vm9 = vcmp.eq.f32.partialorder %v908_v40, %v252_v25 }
 0x1ad   :  { %v267_v35 = vsel %vm259_vm9, %v182_v33, 32 }
 0x1af   :  { %288 = vperm.xlu0 %782, %v269_v23   ;;  %285 = vperm.xlu2 %783, %v268_v24  }
 0x1b0   :  { %204 = vperm.xlu1 %789, %v187_v26  }
 0x1b7   :  { %279 = vperm.xlu0 %782, %v266_v29   ;;  %210 = vperm.xlu2 %783, %v189_v31  }
 0x1b8   :  { %273 = vperm.xlu1 %789, %v264_v32  }
 0x1bf   :  { %213 = vperm.xlu0 %782, %v190_v34   ;;  %201 = vperm.xlu2 %783, %v186_v37  }
 0x1c0   :  { %276 = vperm.xlu1 %789, %v265_v38  }
 0x1c7   :  { %294 = vperm.xlu2 %783, %v271_v28  }
 0x1c8   :  { %198 = vperm.xlu1 %789, %v185_v39  }
 0x1d0   :  { %291 = vperm.xlu1 %789, %v270_v41  }
 0x1d8   :  { %282 = vperm.xlu1 %789, %v267_v35  }
 0x201   :  { %v196_v46 = vpop.permute.xlu2 %195 }
 0x202   :  { %v216_v56 = vperm.slane %v196_v46, %v922_v53 }
 0x209   :  { %v286_v42 = vpop.permute.xlu2 %285 }
 0x20a   :  { %v303_v16 = vperm.slane %v286_v42, %v915_v45 }
 0x211   :  { %v211_v50 = vpop.permute.xlu2 %210 }
 0x212   :  { %v225_v62 = vperm.slane %v211_v50, %v930_v58 }
 0x219   :  { %v208_v43 = vpop.permute.xlu0 %207  ;;  %v202_v40 = vpop.permute.xlu2 %201 }
 0x21a   :  { %v193_v44 = vpop.permute.xlu1 %192  ;;  %v223_v36 = vperm.slane %v208_v43, %v922_v53  ;;  %v220_v0 = vperm.slane %v202_v40, %v927_v57 }
 0x21b   :  { %v215_v55 = vperm.slane %v193_v44, %v915_v45 }
 0x21d   :  { %v217_v1 = vsel %vm122_vm0, %v216_v56, %v215_v55 }
 0x221   :  { %v289_v48 = vpop.permute.xlu0 %288  ;;  %v295_v19 = vpop.permute.xlu2 %294 }
 0x222   :  { %v205_v47 = vpop.permute.xlu1 %204  ;;  %v304_v12 = vperm.slane %v289_v48, %v922_v53  ;;  %v308_v25 = vperm.slane %v295_v19, %v927_v57 }
 0x223   :  { %v222_v52 = vperm.slane %v205_v47, %v915_v45 }
 0x224   :  { %v305_v20 = vsel %vm122_vm0, %v304_v12, %v303_v16 }
 0x225   :  { %v224_v59 = vsel %vm122_vm0, %v223_v36, %v222_v52 }
 0x226   :  { %v226_v2 = vsel %vm126_vm1, %v225_v62, %v224_v59 }
 0x229   :  { %v280_v30 = vpop.permute.xlu0 %279 }
 0x22a   :  { %v274_v49 = vpop.permute.xlu1 %273  ;;  %v299_v22 = vperm.slane %v280_v30, %v930_v58 }
 0x22b   :  { %v296_v18 = vperm.slane %v274_v49, %v915_v45 }
 0x231   :  { %v214_v54 = vpop.permute.xlu0 %213 }
 0x232   :  { %v277_v51 = vpop.permute.xlu1 %276  ;;  %v227_v60 = vperm.slane %v214_v54, %v927_v57 }
 0x233   :  { %v297_v13 = vperm.slane %v277_v51, %v922_v53 }
 0x234   :  { %v228_v4 = vsel %vm130_vm2, %v227_v60, %v226_v2 }
 0x235   :  { %v298_v21 = vsel %vm122_vm0, %v297_v13, %v296_v18 }
 0x236   :  { %v300_v26 = vsel %vm126_vm1, %v299_v22, %v298_v21 }
 0x23a   :  { %v199_v61 = vpop.permute.xlu1 %198 }
 0x23b   :  { %v218_v63 = vperm.slane %v199_v61, %v930_v58 }
 0x23d   :  { %v219_v3 = vsel %vm126_vm1, %v218_v63, %v217_v1 }
 0x23e   :  { %v221_v5 = vsel %vm130_vm2, %v220_v0, %v219_v3 }
 0x23f   :  { %v229_v6 = vsel %vm139_vm3, %v228_v4, %v221_v5 }
 0x240   :  { %v230_v7 = vsel %vm142_vm4, %v229_v6, 2147483647 }
 0x241   :  { %v232_v8 = vshra.s32 %v230_v7, 16 }
 0x242   :  { %v292_v9 = vpop.permute.xlu1 %291 }
 0x243   :  { %v234_v11 = vcvt.s32.f32 %v232_v8  ;;  %v306_v15 = vperm.slane %v292_v9, %v930_v58  ;;  %v231_v58 = vand.u32 65535, %v230_v7 }
 0x245   :  { %235 = vmin.xlane.f32.xlu0 %v234_v11  ;;  %v307_v23 = vsel %vm126_vm1, %v306_v15, %v305_v20  ;;  %v233_v38 = vcvt.s32.f32 %v231_v58 }
 0x246   :  { %v309_v29 = vsel %vm130_vm2, %v308_v25, %v307_v23 }
 0x24a   :  { %v283_v24 = vpop.permute.xlu1 %282 }
 0x24b   :  { %v301_v53 = vperm.slane %v283_v24, %v927_v57 }
 0x24d   :  { %v302_v27 = vsel %vm130_vm2, %v301_v53, %v300_v26 }
 0x24e   :  { %v310_v31 = vsel %vm139_vm3, %v309_v29, %v302_v27 }
 0x24f   :  { %v311_v32 = vsel %vm142_vm4, %v310_v31, 2147483647 }
 0x250   :  { %v313_v33 = vshra.s32 %v311_v32, 16  ;;  %v312_v57 = vand.u32 65535, %v311_v32 }
 0x252   :  { %v315_v34 = vcvt.s32.f32 %v313_v33  ;;  %v314_v41 = vcvt.s32.f32 %v312_v57 }
 0x254   :  { %316 = vmin.xlane.f32.xlu1 %v315_v34 }
 0x2b8   :  { %v236_v37 = vpop.xlane.xlu0 %235 }
 0x2b9   :  { %vm237_vm0 = vcmp.eq.f32.partialorder %v234_v11, %v236_v37  ;;  %v242_v43 = vcvt.f32.s32 %v236_v37 }
 0x2ba   :  { %v238_v28 = vsel %vm237_vm0, %v233_v38, inf }
 0x2bb   :  { %239 = vmin.xlane.f32.xlu2 %v238_v28  ;;  %v243_v46 = vshll.u32 %v242_v43, 16 }
 0x2c7   :  { %v317_v39 = vpop.xlane.xlu1 %316 }
 0x2c8   :  { %vm318_vm1 = vcmp.eq.f32.partialorder %v315_v34, %v317_v39  ;;  %v323_v30 = vcvt.f32.s32 %v317_v39 }
 0x2c9   :  { %v319_v35 = vsel %vm318_vm1, %v314_v41, inf }
 0x2ca   :  { %320 = vmin.xlane.f32.xlu0 %v319_v35  ;;  %v324_v51 = vshll.u32 %v323_v30, 16 }
 0x32e   :  { %v240_v44 = vpop.xlane.xlu2 %239 }
 0x32f   :  { %v241_v47 = vcvt.f32.s32 %v240_v44 }
 0x331   :  { %v244_v48 = vadd.s32 %v243_v46, %v241_v47 }
 0x333   :  { %vm245_vm2 = vcmp.eq.s32.totalorder %v915_v45, %v244_v48 }
 0x334   :  { %v246_v42 = vsel %vm245_vm2, -inf, %v945_v10 }
 0x335   :  { %v329_v49 = vsel %vm142_vm4, %v246_v42, -inf }
 0x336   :  { %330 = vmax.xlane.f32.xlu1 %v329_v49 }
 0x33d   :  { %v321_v50 = vpop.xlane.xlu0 %320 }
 0x33e   :  { %v322_v52 = vcvt.f32.s32 %v321_v50 }
 0x340   :  { %v325_v54 = vadd.s32 %v324_v51, %v322_v52 }
 0x342   :  { %vm326_vm3 = vcmp.eq.s32.totalorder %v915_v45, %v325_v54 }
 0x343   :  { %v327_v36 = vsel %vm326_vm3, inf, %v945_v10 }
 0x344   :  { %v352_v55 = vsel %vm142_vm4, %v327_v36, inf }
 0x345   :  { %353 = vmin.xlane.f32.xlu2 %v352_v55 }
 0x3a9   :  { %v1013_v40 = vpop.xlane.xlu1 %330 }
 0x3aa   :  { %vm332_vm10 = vcmp.eq.f32.partialorder %v246_v42, %v1013_v40 }
 0x3ab   :  { %v333_v56 = vsel %vm332_vm10, %v915_v45, 32 }
 0x3ac   :  { %v334_v59 = vsel %vm142_vm4, %v333_v56, 2147483647 }
 0x3ad   :  { %v336_v60 = vshra.s32 %v334_v59, 16  ;;  %v335_v2 = vand.u32 65535, %v334_v59 }
 0x3af   :  { %v338_v61 = vcvt.s32.f32 %v336_v60  ;;  %v337_v4 = vcvt.s32.f32 %v335_v2 }
 0x3b1   :  { %339 = vmin.xlane.f32.xlu0 %v338_v61 }
 0x3b8   :  { %v1018_v62 = vpop.xlane.xlu2 %353 }
 0x3b9   :  { %vm355_vm11 = vcmp.eq.f32.partialorder %v327_v36, %v1018_v62 }
 0x3ba   :  { %v356_v10 = vsel %vm355_vm11, %v915_v45, 32 }
 0x3bb   :  { %v357_v63 = vsel %vm142_vm4, %v356_v10, 2147483647 }
 0x3bc   :  { %v359_v0 = vshra.s32 %v357_v63, 16  ;;  %v358_v6 = vand.u32 65535, %v357_v63 }
 0x3be   :  { %v361_v1 = vcvt.s32.f32 %v359_v0  ;;  %v360_v8 = vcvt.s32.f32 %v358_v6 }
 0x3c0   :  { %362 = vmin.xlane.f32.xlu1 %v361_v1 }
 0x424   :  { %v340_v3 = vpop.xlane.xlu0 %339 }
 0x425   :  { %vm341_vm12 = vcmp.eq.f32.partialorder %v338_v61, %v340_v3  ;;  %v346_v11 = vcvt.f32.s32 %v340_v3 }
 0x426   :  { %v342_v5 = vsel %vm341_vm12, %v337_v4, inf }
 0x427   :  { %343 = vmin.xlane.f32.xlu2 %v342_v5  ;;  %v347_v13 = vshll.u32 %v346_v11, 16 }
 0x433   :  { %v363_v7 = vpop.xlane.xlu1 %362 }
 0x434   :  { %vm364_vm13 = vcmp.eq.f32.partialorder %v361_v1, %v363_v7  ;;  %v369_v20 = vcvt.f32.s32 %v363_v7 }
 0x435   :  { %v365_v9 = vsel %vm364_vm13, %v360_v8, inf }
 0x436   :  { %366 = vmin.xlane.f32.xlu0 %v365_v9  ;;  %v370_v22 = vshll.u32 %v369_v20, 16 }
 0x49a   :  { %v344_v12 = vpop.xlane.xlu2 %343 }
 0x49b   :  { %v345_v15 = vcvt.f32.s32 %v344_v12 }
 0x49d   :  { %v348_v16 = vadd.s32 %v347_v13, %v345_v15 }
 0x49f   :  { %vm349_vm14 = vcmp.eq.s32.totalorder %v915_v45, %v348_v16 }
 0x4a0   :  { %v350_v18 = vsel %vm349_vm14, -inf, %v246_v42 }
 0x4a1   :  { %v375_v19 = vsel %vm142_vm4, %v350_v18, -inf }
 0x4a2   :  { %376 = vmax.xlane.f32.xlu1 %v375_v19 }
 0x4a9   :  { %v367_v21 = vpop.xlane.xlu0 %366 }
 0x4aa   :  { %v368_v23 = vcvt.f32.s32 %v367_v21 }
 0x4ac   :  { %v371_v24 = vadd.s32 %v370_v22, %v368_v23 }
 0x4ae   :  { %vm372_vm15 = vcmp.eq.s32.totalorder %v915_v45, %v371_v24 }
 0x4af   :  { %v373_v25 = vsel %vm372_vm15, inf, %v327_v36 }
 0x4b0   :  { %v398_v53 = vsel %vm142_vm4, %v373_v25, inf }
 0x4b1   :  { %399 = vmin.xlane.f32.xlu2 %v398_v53 }
 0x515   :  { %v1027_v26 = vpop.xlane.xlu1 %376 }
 0x516   :  { %vm378_vm5 = vcmp.eq.f32.partialorder %v350_v18, %v1027_v26 }
 0x517   :  { %v379_v27 = vsel %vm378_vm5, %v915_v45, 32 }
 0x518   :  { %v380_v29 = vsel %vm142_vm4, %v379_v27, 2147483647 }
 0x519   :  { %v382_v31 = vshra.s32 %v380_v29, 16  ;;  %v381_v28 = vand.u32 65535, %v380_v29 }
 0x51b   :  { %v384_v32 = vcvt.s32.f32 %v382_v31  ;;  %v383_v39 = vcvt.s32.f32 %v381_v28 }
 0x51d   :  { %385 = vmin.xlane.f32.xlu0 %v384_v32 }
 0x524   :  { %v1032_v33 = vpop.xlane.xlu2 %399 }
 0x525   :  { %vm401_vm6 = vcmp.eq.f32.partialorder %v373_v25, %v1032_v33 }
 0x526   :  { %v402_v34 = vsel %vm401_vm6, %v915_v45, 32 }
 0x527   :  { %v403_v58 = vsel %vm142_vm4, %v402_v34, 2147483647 }
 0x528   :  { %v405_v37 = vshra.s32 %v403_v58, 16  ;;  %v404_v35 = vand.u32 65535, %v403_v58 }
 0x52a   :  { %v407_v38 = vcvt.s32.f32 %v405_v37  ;;  %v406_v44 = vcvt.s32.f32 %v404_v35 }
 0x52c   :  { %408 = vmin.xlane.f32.xlu1 %v407_v38 }
 0x590   :  { %v386_v57 = vpop.xlane.xlu0 %385 }
 0x591   :  { %vm387_vm7 = vcmp.eq.f32.partialorder %v384_v32, %v386_v57  ;;  %v392_v47 = vcvt.f32.s32 %v386_v57 }
 0x592   :  { %v388_v41 = vsel %vm387_vm7, %v383_v39, inf }
 0x593   :  { %389 = vmin.xlane.f32.xlu2 %v388_v41  ;;  %v393_v42 = vshll.u32 %v392_v47, 16 }
 0x59f   :  { %v409_v43 = vpop.xlane.xlu1 %408 }
 0x5a0   :  { %vm410_vm8 = vcmp.eq.f32.partialorder %v407_v38, %v409_v43  ;;  %v415_v52 = vcvt.f32.s32 %v409_v43 }
 0x5a1   :  { %v411_v46 = vsel %vm410_vm8, %v406_v44, inf }
 0x5a2   :  { %412 = vmin.xlane.f32.xlu0 %v411_v46  ;;  %v416_v36 = vshll.u32 %v415_v52, 16 }
 0x606   :  { %v390_v48 = vpop.xlane.xlu2 %389 }
 0x607   :  { %v391_v49 = vcvt.f32.s32 %v390_v48 }
 0x609   :  { %v394_v30 = vadd.s32 %v393_v42, %v391_v49 }
 0x60b   :  { %vm395_vm9 = vcmp.eq.s32.totalorder %v915_v45, %v394_v30 }
 0x60c   :  { %v396_v50 = vsel %vm395_vm9, -inf, %v350_v18 }
 0x60d   :  { %v421_v51 = vsel %vm142_vm4, %v396_v50, -inf }
 0x60e   :  { %422 = vmax.xlane.f32.xlu1 %v421_v51 }
 0x615   :  { %v413_v54 = vpop.xlane.xlu0 %412 }
 0x616   :  { %v414_v55 = vcvt.f32.s32 %v413_v54 }
 0x618   :  { %v417_v56 = vadd.s32 %v416_v36, %v414_v55 }
 0x61a   :  { %vm418_vm0 = vcmp.eq.s32.totalorder %v915_v45, %v417_v56 }
 0x61b   :  { %v419_v59 = vsel %vm418_vm0, inf, %v373_v25 }
 0x61c   :  { %v444_v60 = vsel %vm142_vm4, %v419_v59, inf }
 0x61d   :  { %445 = vmin.xlane.f32.xlu2 %v444_v60 }
 0x681   :  { %v1041_v61 = vpop.xlane.xlu1 %422 }
 0x682   :  { %vm424_vm1 = vcmp.eq.f32.partialorder %v396_v50, %v1041_v61 }
 0x683   :  { %v425_v10 = vsel %vm424_vm1, %v915_v45, 32 }
 0x684   :  { %v426_v63 = vsel %vm142_vm4, %v425_v10, 2147483647 }
 0x685   :  { %v428_v0 = vshra.s32 %v426_v63, 16  ;;  %v427_v7 = vand.u32 65535, %v426_v63 }
 0x687   :  { %v430_v1 = vcvt.s32.f32 %v428_v0  ;;  %v429_v9 = vcvt.s32.f32 %v427_v7 }
 0x689   :  { %431 = vmin.xlane.f32.xlu0 %v430_v1 }
 0x690   :  { %v1046_v2 = vpop.xlane.xlu2 %445 }
 0x691   :  { %vm447_vm2 = vcmp.eq.f32.partialorder %v419_v59, %v1046_v2 }
 0x692   :  { %v448_v3 = vsel %vm447_vm2, %v915_v45, 32 }
 0x693   :  { %v449_v4 = vsel %vm142_vm4, %v448_v3, 2147483647 }
 0x694   :  { %v451_v5 = vshra.s32 %v449_v4, 16  ;;  %v450_v12 = vand.u32 65535, %v449_v4 }
 0x696   :  { %v453_v6 = vcvt.s32.f32 %v451_v5  ;;  %v452_v15 = vcvt.s32.f32 %v450_v12 }
 0x698   :  { %454 = vmin.xlane.f32.xlu1 %v453_v6 }
 0x6fc   :  { %v432_v8 = vpop.xlane.xlu0 %431 }
 0x6fd   :  { %vm433_vm3 = vcmp.eq.f32.partialorder %v430_v1, %v432_v8  ;;  %v438_v18 = vcvt.f32.s32 %v432_v8 }
 0x6fe   :  { %v434_v11 = vsel %vm433_vm3, %v429_v9, inf }
 0x6ff   :  { %435 = vmin.xlane.f32.xlu2 %v434_v11  ;;  %v439_v20 = vshll.u32 %v438_v18, 16 }
 0x70b   :  { %v455_v13 = vpop.xlane.xlu1 %454 }
 0x70c   :  { %vm456_vm10 = vcmp.eq.f32.partialorder %v453_v6, %v455_v13  ;;  %v461_v25 = vcvt.f32.s32 %v455_v13 }
 0x70d   :  { %v457_v16 = vsel %vm456_vm10, %v452_v15, inf }
 0x70e   :  { %458 = vmin.xlane.f32.xlu0 %v457_v16  ;;  %v462_v27 = vshll.u32 %v461_v25, 16 }
 0x772   :  { %v436_v19 = vpop.xlane.xlu2 %435 }
 0x773   :  { %v437_v21 = vcvt.f32.s32 %v436_v19 }
 0x775   :  { %v440_v22 = vadd.s32 %v439_v20, %v437_v21 }
 0x777   :  { %vm441_vm11 = vcmp.eq.s32.totalorder %v915_v45, %v440_v22 }
 0x778   :  { %v442_v23 = vsel %vm441_vm11, -inf, %v396_v50 }
 0x779   :  { %v467_v24 = vsel %vm142_vm4, %v442_v23, -inf }
 0x77a   :  { %468 = vmax.xlane.f32.xlu1 %v467_v24 }
 0x781   :  { %v459_v53 = vpop.xlane.xlu0 %458 }
 0x782   :  { %v460_v29 = vcvt.f32.s32 %v459_v53 }
 0x784   :  { %v463_v31 = vadd.s32 %v462_v27, %v460_v29 }
 0x786   :  { %vm464_vm12 = vcmp.eq.s32.totalorder %v915_v45, %v463_v31 }
 0x787   :  { %v465_v32 = vsel %vm464_vm12, inf, %v419_v59 }
 0x788   :  { %v490_v34 = vsel %vm142_vm4, %v465_v32, inf }
 0x789   :  { %491 = vmin.xlane.f32.xlu2 %v490_v34 }
 0x7ed   :  { %v1055_v58 = vpop.xlane.xlu1 %468 }
 0x7ee   :  { %vm470_vm13 = vcmp.eq.f32.partialorder %v442_v23, %v1055_v58 }
 0x7ef   :  { %v471_v37 = vsel %vm470_vm13, %v915_v45, 32 }
 0x7f0   :  { %v472_v38 = vsel %vm142_vm4, %v471_v37, 2147483647 }
 0x7f1   :  { %v474_v28 = vshra.s32 %v472_v38, 16  ;;  %v473_v46 = vand.u32 65535, %v472_v38 }
 0x7f3   :  { %v476_v57 = vcvt.s32.f32 %v474_v28  ;;  %v475_v48 = vcvt.s32.f32 %v473_v46 }
 0x7f5   :  { %477 = vmin.xlane.f32.xlu0 %v476_v57 }
 0x7fc   :  { %v1060_v39 = vpop.xlane.xlu2 %491 }
 0x7fd   :  { %vm493_vm14 = vcmp.eq.f32.partialorder %v465_v32, %v1060_v39 }
 0x7fe   :  { %v494_v41 = vsel %vm493_vm14, %v915_v45, 32 }
 0x7ff   :  { %v495_v35 = vsel %vm142_vm4, %v494_v41, 2147483647 }
 0x800   :  { %v497_v43 = vshra.s32 %v495_v35, 16  ;;  %v496_v49 = vand.u32 65535, %v495_v35 }
 0x802   :  { %v499_v44 = vcvt.s32.f32 %v497_v43  ;;  %v498_v50 = vcvt.s32.f32 %v496_v49 }
 0x804   :  { %500 = vmin.xlane.f32.xlu1 %v499_v44 }
 0x868   :  { %v478_v47 = vpop.xlane.xlu0 %477 }
 0x869   :  { %vm479_vm15 = vcmp.eq.f32.partialorder %v476_v57, %v478_v47  ;;  %v484_v52 = vcvt.f32.s32 %v478_v47 }
 0x86a   :  { %v480_v42 = vsel %vm479_vm15, %v475_v48, inf }
 0x86b   :  { %481 = vmin.xlane.f32.xlu2 %v480_v42  ;;  %v485_v36 = vshll.u32 %v484_v52, 16 }
 0x877   :  { %v501_v30 = vpop.xlane.xlu1 %500 }
 0x878   :  { %vm502_vm5 = vcmp.eq.f32.partialorder %v499_v44, %v501_v30  ;;  %v507_v10 = vcvt.f32.s32 %v501_v30 }
 0x879   :  { %v503_v51 = vsel %vm502_vm5, %v498_v50, inf }
 0x87a   :  { %504 = vmin.xlane.f32.xlu0 %v503_v51  ;;  %v508_v0 = vshll.u32 %v507_v10, 16 }
 0x8de   :  { %v482_v54 = vpop.xlane.xlu2 %481 }
 0x8df   :  { %v483_v55 = vcvt.f32.s32 %v482_v54 }
 0x8e1   :  { %v486_v56 = vadd.s32 %v485_v36, %v483_v55 }
 0x8e3   :  { %vm487_vm6 = vcmp.eq.s32.totalorder %v915_v45, %v486_v56 }
 0x8e4   :  { %v488_v59 = vsel %vm487_vm6, -inf, %v442_v23 }
 0x8e5   :  { %v513_v60 = vsel %vm142_vm4, %v488_v59, -inf }
 0x8e6   :  { %514 = vmax.xlane.f32.xlu1 %v513_v60 }
 0x8ed   :  { %v505_v63 = vpop.xlane.xlu0 %504 }
 0x8ee   :  { %v506_v1 = vcvt.f32.s32 %v505_v63 }
 0x8f0   :  { %v509_v3 = vadd.s32 %v508_v0, %v506_v1 }
 0x8f2   :  { %vm510_vm7 = vcmp.eq.s32.totalorder %v915_v45, %v509_v3 }
 0x8f3   :  { %v511_v4 = vsel %vm510_vm7, inf, %v465_v32 }
 0x8f4   :  { %v536_v5 = vsel %vm142_vm4, %v511_v4, inf }
 0x8f5   :  { %537 = vmin.xlane.f32.xlu2 %v536_v5 }
 0x959   :  { %v1069_v6 = vpop.xlane.xlu1 %514 }
 0x95a   :  { %vm516_vm8 = vcmp.eq.f32.partialorder %v488_v59, %v1069_v6 }
 0x95b   :  { %v517_v7 = vsel %vm516_vm8, %v915_v45, 32 }
 0x95c   :  { %v518_v8 = vsel %vm142_vm4, %v517_v7, 2147483647 }
 0x95d   :  { %v520_v9 = vshra.s32 %v518_v8, 16  ;;  %v519_v19 = vand.u32 65535, %v518_v8 }
 0x95f   :  { %v522_v11 = vcvt.s32.f32 %v520_v9  ;;  %v521_v21 = vcvt.s32.f32 %v519_v19 }
 0x961   :  { %523 = vmin.xlane.f32.xlu0 %v522_v11 }
 0x968   :  { %v1074_v12 = vpop.xlane.xlu2 %537 }
 0x969   :  { %vm539_vm9 = vcmp.eq.f32.partialorder %v511_v4, %v1074_v12 }
 0x96a   :  { %v540_v13 = vsel %vm539_vm9, %v915_v45, 32 }
 0x96b   :  { %v541_v15 = vsel %vm142_vm4, %v540_v13, 2147483647 }
 0x96c   :  { %v543_v16 = vshra.s32 %v541_v15, 16  ;;  %v542_v23 = vand.u32 65535, %v541_v15 }
 0x96e   :  { %v545_v18 = vcvt.s32.f32 %v543_v16  ;;  %v544_v25 = vcvt.s32.f32 %v542_v23 }
 0x970   :  { %546 = vmin.xlane.f32.xlu1 %v545_v18 }
 0x9d4   :  { %v524_v20 = vpop.xlane.xlu0 %523 }
 0x9d5   :  { %vm525_vm0 = vcmp.eq.f32.partialorder %v522_v11, %v524_v20  ;;  %v530_v27 = vcvt.f32.s32 %v524_v20 }
 0x9d6   :  { %v526_v22 = vsel %vm525_vm0, %v521_v21, inf }
 0x9d7   :  { %527 = vmin.xlane.f32.xlu2 %v526_v22  ;;  %v531_v31 = vshll.u32 %v530_v27, 16 }
 0x9e3   :  { %v547_v24 = vpop.xlane.xlu1 %546 }
 0x9e4   :  { %vm548_vm1 = vcmp.eq.f32.partialorder %v545_v18, %v547_v24  ;;  %v553_v28 = vcvt.f32.s32 %v547_v24 }
 0x9e5   :  { %v549_v53 = vsel %vm548_vm1, %v544_v25, inf }
 0x9e6   :  { %550 = vmin.xlane.f32.xlu0 %v549_v53  ;;  %v554_v41 = vshll.u32 %v553_v28, 16 }
 0xa4a   :  { %v528_v29 = vpop.xlane.xlu2 %527 }
 0xa4b   :  { %v529_v32 = vcvt.f32.s32 %v528_v29 }
 0xa4d   :  { %v532_v34 = vadd.s32 %v531_v31, %v529_v32 }
 0xa4f   :  { %vm533_vm2 = vcmp.eq.s32.totalorder %v915_v45, %v532_v34 }
 0xa50   :  { %v534_v37 = vsel %vm533_vm2, -inf, %v488_v59 }
 0xa51   :  { %v559_v38 = vsel %vm142_vm4, %v534_v37, -inf }
 0xa52   :  { %560 = vmax.xlane.f32.xlu1 %v559_v38 }
 0xa59   :  { %v551_v57 = vpop.xlane.xlu0 %550 }
 0xa5a   :  { %v552_v35 = vcvt.f32.s32 %v551_v57 }
 0xa5c   :  { %v555_v43 = vadd.s32 %v554_v41, %v552_v35 }
 0xa5e   :  { %vm556_vm3 = vcmp.eq.s32.totalorder %v915_v45, %v555_v43 }
 0xa5f   :  { %v557_v44 = vsel %vm556_vm3, inf, %v511_v4 }
 0xa60   :  { %v582_v46 = vsel %vm142_vm4, %v557_v44, inf }
 0xa61   :  { %583 = vmin.xlane.f32.xlu2 %v582_v46 }
 0xac5   :  { %v1083_v47 = vpop.xlane.xlu1 %560 }
 0xac6   :  { %vm562_vm10 = vcmp.eq.f32.partialorder %v534_v37, %v1083_v47 }
 0xac7   :  { %v563_v48 = vsel %vm562_vm10, %v915_v45, 32 }
 0xac8   :  { %v564_v42 = vsel %vm142_vm4, %v563_v48, 2147483647 }
 0xac9   :  { %v566_v49 = vshra.s32 %v564_v42, 16  ;;  %v565_v55 = vand.u32 65535, %v564_v42 }
 0xacb   :  { %v568_v30 = vcvt.s32.f32 %v566_v49  ;;  %v567_v59 = vcvt.s32.f32 %v565_v55 }
 0xacd   :  { %569 = vmin.xlane.f32.xlu0 %v568_v30 }
 0xad4   :  { %v1088_v50 = vpop.xlane.xlu2 %583 }
 0xad5   :  { %vm585_vm11 = vcmp.eq.f32.partialorder %v557_v44, %v1088_v50 }
 0xad6   :  { %v586_v51 = vsel %vm585_vm11, %v915_v45, 32 }
 0xad7   :  { %v587_v52 = vsel %vm142_vm4, %v586_v51, 2147483647 }
 0xad8   :  { %v589_v54 = vshra.s32 %v587_v52, 16  ;;  %v588_v10 = vand.u32 65535, %v587_v52 }
 0xada   :  { %v591_v36 = vcvt.s32.f32 %v589_v54  ;;  %v590_v0 = vcvt.s32.f32 %v588_v10 }
 0xadc   :  { %592 = vmin.xlane.f32.xlu1 %v591_v36 }
 0xb40   :  { %v570_v56 = vpop.xlane.xlu0 %569 }
 0xb41   :  { %vm571_vm12 = vcmp.eq.f32.partialorder %v568_v30, %v570_v56  ;;  %v576_v3 = vcvt.f32.s32 %v570_v56 }
 0xb42   :  { %v572_v60 = vsel %vm571_vm12, %v567_v59, inf }
 0xb43   :  { %573 = vmin.xlane.f32.xlu2 %v572_v60  ;;  %v577_v5 = vshll.u32 %v576_v3, 16 }
 0xb4f   :  { %v593_v63 = vpop.xlane.xlu1 %592 }
 0xb50   :  { %vm594_vm13 = vcmp.eq.f32.partialorder %v591_v36, %v593_v63  ;;  %v599_v13 = vcvt.f32.s32 %v593_v63 }
 0xb51   :  { %v595_v1 = vsel %vm594_vm13, %v590_v0, inf }
 0xb52   :  { %596 = vmin.xlane.f32.xlu0 %v595_v1  ;;  %v600_v16 = vshll.u32 %v599_v13, 16 }
 0xbb6   :  { %v574_v4 = vpop.xlane.xlu2 %573 }
 0xbb7   :  { %v575_v7 = vcvt.f32.s32 %v574_v4 }
 0xbb9   :  { %v578_v8 = vadd.s32 %v577_v5, %v575_v7 }
 0xbbb   :  { %vm579_vm14 = vcmp.eq.s32.totalorder %v915_v45, %v578_v8 }
 0xbbc   :  { %v580_v9 = vsel %vm579_vm14, -inf, %v534_v37  ;;  %vm726_vm14 = vcmask 1024  }
 0xbbd   :  { %v605_v11 = vsel %vm142_vm4, %v580_v9, -inf }
 0xbbe   :  { %606 = vmax.xlane.f32.xlu1 %v605_v11 }
 0xbc5   :  { %v597_v15 = vpop.xlane.xlu0 %596 }
 0xbc6   :  { %v598_v18 = vcvt.f32.s32 %v597_v15 }
 0xbc8   :  { %v601_v19 = vadd.s32 %v600_v16, %v598_v18 }
 0xbca   :  { %vm602_vm15 = vcmp.eq.s32.totalorder %v915_v45, %v601_v19 }
 0xbcb   :  { %v603_v20 = vsel %vm602_vm15, inf, %v557_v44 }
 0xbcc   :  { %v628_v21 = vsel %vm142_vm4, %v603_v20, inf }
 0xbcd   :  { %629 = vmin.xlane.f32.xlu2 %v628_v21 }
 0xc31   :  { %v1097_v22 = vpop.xlane.xlu1 %606 }
 0xc32   :  { %vm608_vm5 = vcmp.eq.f32.partialorder %v580_v9, %v1097_v22 }
 0xc33   :  { %v609_v23 = vsel %vm608_vm5, %v915_v45, 32 }
 0xc34   :  { %v610_v24 = vsel %vm142_vm4, %v609_v23, 2147483647 }
 0xc35   :  { %v612_v25 = vshra.s32 %v610_v24, 16  ;;  %v611_v37 = vand.u32 65535, %v610_v24 }
 0xc37   :  { %v614_v53 = vcvt.s32.f32 %v612_v25  ;;  %v613_v28 = vcvt.s32.f32 %v611_v37 }
 0xc39   :  { %615 = vmin.xlane.f32.xlu0 %v614_v53 }
 0xc40   :  { %v1102_v27 = vpop.xlane.xlu2 %629 }
 0xc41   :  { %vm631_vm6 = vcmp.eq.f32.partialorder %v603_v20, %v1102_v27 }
 0xc42   :  { %v632_v29 = vsel %vm631_vm6, %v915_v45, 32 }
 0xc43   :  { %v633_v31 = vsel %vm142_vm4, %v632_v29, 2147483647 }
 0xc44   :  { %v635_v32 = vshra.s32 %v633_v31, 16  ;;  %v634_v41 = vand.u32 65535, %v633_v31 }
 0xc46   :  { %v637_v34 = vcvt.s32.f32 %v635_v32  ;;  %v636_v43 = vcvt.s32.f32 %v634_v41 }
 0xc48   :  { %638 = vmin.xlane.f32.xlu1 %v637_v34 }
 0xcac   :  { %v616_v38 = vpop.xlane.xlu0 %615 }
 0xcad   :  { %vm617_vm7 = vcmp.eq.f32.partialorder %v614_v53, %v616_v38  ;;  %v622_v46 = vcvt.f32.s32 %v616_v38 }
 0xcae   :  { %v618_v57 = vsel %vm617_vm7, %v613_v28, inf }
 0xcaf   :  { %619 = vmin.xlane.f32.xlu2 %v618_v57  ;;  %v623_v42 = vshll.u32 %v622_v46, 16  ;;  %v374_v46 = vadd.f32 %v1018_v62, %v955_v17 }
 0xcbb   :  { %v639_v35 = vpop.xlane.xlu1 %638 }
 0xcbc   :  { %vm640_vm8 = vcmp.eq.f32.partialorder %v637_v34, %v639_v35  ;;  %v645_v54 = vcvt.f32.s32 %v639_v35 }
 0xcbd   :  { %v641_v44 = vsel %vm640_vm8, %v636_v43, inf }
 0xcbe   :  { %642 = vmin.xlane.f32.xlu0 %v641_v44  ;;  %v646_v55 = vshll.u32 %v645_v54, 16  ;;  %v351_v44 = vadd.f32 %v1013_v40, %v951_v14 }
 0xd22   :  { %v620_v48 = vpop.xlane.xlu2 %619 }
 0xd23   :  { %v621_v49 = vcvt.f32.s32 %v620_v48  ;;  %v397_v48 = vadd.f32 %v1027_v26, %v351_v44 }
 0xd25   :  { %v624_v30 = vadd.s32 %v623_v42, %v621_v49  ;;  %v420_v42 = vadd.f32 %v1032_v33, %v374_v46  ;;  %v443_v49 = vadd.f32 %v1041_v61, %v397_v48 }
 0xd27   :  { %vm625_vm9 = vcmp.eq.s32.totalorder %v915_v45, %v624_v30  ;;  %v466_v30 = vadd.f32 %v1046_v2, %v420_v42 }
 0xd28   :  { %v626_v51 = vsel %vm625_vm9, -inf, %v580_v9 }
 0xd29   :  { %v651_v52 = vsel %vm142_vm4, %v626_v51, -inf }
 0xd2a   :  { %652 = vmax.xlane.f32.xlu1 %v651_v52 }
 0xd31   :  { %v643_v36 = vpop.xlane.xlu0 %642 }
 0xd32   :  { %v644_v56 = vcvt.f32.s32 %v643_v36 }
 0xd34   :  { %v647_v59 = vadd.s32 %v646_v55, %v644_v56 }
 0xd36   :  { %vm648_vm0 = vcmp.eq.s32.totalorder %v915_v45, %v647_v59 }
 0xd37   :  { %v649_v60 = vsel %vm648_vm0, inf, %v603_v20 }
 0xd38   :  { %v674_v10 = vsel %vm142_vm4, %v649_v60, inf }
 0xd39   :  { %675 = vmin.xlane.f32.xlu2 %v674_v10 }
 0xd9d   :  { %v653_v63 = vpop.xlane.xlu1 %652 }
 0xd9e   :  { %vm654_vm1 = vcmp.eq.f32.partialorder %v626_v51, %v653_v63 }
 0xd9f   :  { %v655_v0 = vsel %vm654_vm1, %v915_v45, 32 }
 0xda0   :  { %v656_v1 = vsel %vm142_vm4, %v655_v0, 2147483647 }
 0xda1   :  { %v658_v3 = vshra.s32 %v656_v1, 16  ;;  %v657_v13 = vand.u32 65535, %v656_v1 }
 0xda3   :  { %v660_v4 = vcvt.s32.f32 %v658_v3  ;;  %v659_v16 = vcvt.s32.f32 %v657_v13 }
 0xda5   :  { %661 = vmin.xlane.f32.xlu0 %v660_v4 }
 0xdac   :  { %v676_v5 = vpop.xlane.xlu2 %675 }
 0xdad   :  { %vm677_vm2 = vcmp.eq.f32.partialorder %v649_v60, %v676_v5 }
 0xdae   :  { %v678_v7 = vsel %vm677_vm2, %v915_v45, 32 }
 0xdaf   :  { %v679_v8 = vsel %vm142_vm4, %v678_v7, 2147483647 }
 0xdb0   :  { %v681_v9 = vshra.s32 %v679_v8, 16  ;;  %v680_v19 = vand.u32 65535, %v679_v8 }
 0xdb2   :  { %v683_v11 = vcvt.s32.f32 %v681_v9  ;;  %v682_v21 = vcvt.s32.f32 %v680_v19 }
 0xdb4   :  { %684 = vmin.xlane.f32.xlu1 %v683_v11 }
 0xe18   :  { %v662_v15 = vpop.xlane.xlu0 %661 }
 0xe19   :  { %vm663_vm3 = vcmp.eq.f32.partialorder %v660_v4, %v662_v15  ;;  %v668_v24 = vcvt.f32.s32 %v662_v15 }
 0xe1a   :  { %v664_v18 = vsel %vm663_vm3, %v659_v16, inf }
 0xe1b   :  { %665 = vmin.xlane.f32.xlu2 %v664_v18  ;;  %v669_v53 = vshll.u32 %v668_v24, 16 }
 0xe27   :  { %v685_v20 = vpop.xlane.xlu1 %684 }
 0xe28   :  { %vm686_vm10 = vcmp.eq.f32.partialorder %v683_v11, %v685_v20  ;;  %v691_v37 = vcvt.f32.s32 %v685_v20 }
 0xe29   :  { %v687_v23 = vsel %vm686_vm10, %v682_v21, inf }
 0xe2a   :  { %688 = vmin.xlane.f32.xlu0 %v687_v23  ;;  %v692_v28 = vshll.u32 %v691_v37, 16 }
 0xe8e   :  { %v666_v25 = vpop.xlane.xlu2 %665 }
 0xe8f   :  { %v667_v29 = vcvt.f32.s32 %v666_v25 }
 0xe91   :  { %v670_v31 = vadd.s32 %v669_v53, %v667_v29 }
 0xe93   :  { %vm671_vm11 = vcmp.eq.s32.totalorder %v915_v45, %v670_v31 }
 0xe94   :  { %v672_v32 = vsel %vm671_vm11, -inf, %v626_v51  ;;  %v512_v51 = vadd.f32 %v1060_v39, %v466_v30 }
 0xe95   :  { %v697_v34 = vsel %vm142_vm4, %v672_v32, -inf }
 0xe96   :  { %698 = vmax.xlane.f32.xlu1 %v697_v34  ;;  %v558_v54 = vadd.f32 %v1074_v12, %v512_v51 }
 0xe98   :  { %v604_v17 = vadd.f32 %v1088_v50, %v558_v54 }
 0xe9a   :  { %v650_v62 = vadd.f32 %v1102_v27, %v604_v17 }
 0xe9c   :  { %v696_v61 = vadd.f32 %v676_v5, %v650_v62 }
 0xe9d   :  { %v689_v38 = vpop.xlane.xlu0 %688 }
 0xe9e   :  { %v690_v57 = vcvt.f32.s32 %v689_v38 }
 0xea0   :  { %v693_v41 = vadd.s32 %v692_v28, %v690_v57 }
 0xea2   :  { %vm694_vm12 = vcmp.eq.s32.totalorder %v915_v45, %v693_v41  ;;  %v489_v45 = vadd.f32 %v1055_v58, %v443_v49 }
 0xea3   :  { %v695_v35 = vsel %vm694_vm12, inf, %v649_v60 }
 0xea4   :  { %v701_v43 = vsel %vm142_vm4, %v695_v35, inf  ;;  %v535_v52 = vadd.f32 %v1069_v6, %v489_v45 }
 0xea5   :  { %702 = vmin.xlane.f32.xlu2 %v701_v43 }
 0xea6   :  { %v581_v14 = vadd.f32 %v1083_v47, %v535_v52 }
 0xea8   :  { %v627_v40 = vadd.f32 %v1097_v22, %v581_v14 }
 0xeaa   :  { %v673_v33 = vadd.f32 %v653_v63, %v627_v40 }
 0xf09   :  { %v699_v26 = vpop.xlane.xlu1 %698 }
 0xf0a   :  { %v700_v36 = vadd.f32 %v699_v26, %v673_v33 }
 0xf18   :  { %v703_v2 = vpop.xlane.xlu2 %702 }
 0xf19   :  { %v704_v58 = vadd.f32 %v703_v2, %v696_v61 }
 0xf1b   :  { %v705_v55 = vadd.f32 %v704_v58, %v700_v36 }
 0xf1d   :  { %v732_v39 = vmul.f32 -0.05, %v705_v55 }
 0xf1f   :  { %v708_v56 = vmul.f32 1.442695, %v732_v39 }
 0xf21   :  { %791 = vpow2.f32 %v708_v56 }
 0xf27   :  { %v792_v6 = vpop.eup %791 }
 0xf28   :  { %v710_v12 = vadd.f32 1.0, %v792_v6 }
 0xf2a   :  { %793 = vrcp.f32 %v710_v12  ;;  %v722_v60 = vand.u32 2147483648, %v710_v12  ;;  %v720_v27 = vand.u32 2147483647, %v710_v12  ;;  %vm716_vm13 = vweird.f32 %v710_v12 }
 0xf2c   :  { %v723_v63 = vor.u32 1.1754944e-38, %v722_v60  ;;  %vm721_vm5 = vcmp.eq.f32.partialorder %v720_v27, 8.507059e+37 }
 0xf30   :  { %v794_v47 = vpop.eup %793 }
 0xf31   :  { %v712_v59 = vmul.f32 %v794_v47, %v710_v12  ;;  %vm717_vm4 = vweird.f32 %v794_v47 }
 0xf32   :  { %vm718_vm15 = vmor %vm716_vm13, %vm717_vm4 }
 0xf33   :  { %v713_v50 = vsub.f32 1.0, %v712_v59 }
 0xf35   :  { %v714_v22 = vmul.f32 %v794_v47, %v713_v50 }
 0xf37   :  { %v715_v10 = vadd.f32 %v794_v47, %v714_v22 }
 0xf39   :  { %v719_v0 = vsel %vm718_vm15, %v794_v47, %v715_v10 }
 0xf3a   :  { %v724_v1 = vsel %vm721_vm5, %v723_v63, %v719_v0 }
 0xf3b   :  { %727 = vst.msk [vmem:[%s1141_s3] sm:$0x3] %vm726_vm14, %v724_v1 }

</bundles_post_ra>
